<compile_context>
chip_gen: v5e
topology: v5e:2x2
jax: 0.10.0
libtpu: 0.0.40
codegen_flags: <defaults>
</compile_context>

<pallas_src>
import functools

import numpy as np
import jax
import jax.numpy as jnp
from jax import lax
from jax.experimental import pallas as pl
from jax.experimental.pallas import tpu as pltpu


# ----------------------------------------------------------------------------
# One-time XLA layout glue: im2col LHS for layer 1 only (k=4, s=2, p=1).
# ----------------------------------------------------------------------------
def _im2col_l1(x_nhwc):
    B, H, W, C = x_nhwc.shape
    Ho, Wo = H // 2, W // 2
    xp = jnp.pad(x_nhwc, ((0, 0), (1, 1), (1, 1), (0, 0)))
    taps = []
    for kh in range(4):
        for kw in range(4):
            sl = lax.slice(xp, (0, kh, kw, 0),
                           (B, kh + 2 * Ho - 1, kw + 2 * Wo - 1, C),
                           (1, 2, 2, 1))                  # (B, Ho, Wo, C)
            taps.append(sl)
    pat = jnp.stack(taps, axis=3)                         # (B, Ho, Wo, 16, C)
    return pat.reshape(B, Ho * Wo, 16 * C)


def _sel_matrix(h_in, w_in, h_out, w_out):
    """(16*Nout, Nin) 0/1 gather matrix for a k=4, s=2, p=1 conv.

    Row k*Nout + (oh*w_out + ow) selects input pixel (2*oh+kh-1, 2*ow+kw-1)
    of the *unpadded* input (all-zero row for padding positions).  Exact in
    bf16, so (T @ act_bf16) with f32 accumulation reproduces the tap values
    bit-for-bit.
    """
    n_out, n_in = h_out * w_out, h_in * w_in
    T = np.zeros((16 * n_out, n_in), np.float32)
    for kh in range(4):
        for kw in range(4):
            k = 4 * kh + kw
            for oh in range(h_out):
                ih = 2 * oh + kh - 1
                if not 0 <= ih < h_in:
                    continue
                for ow in range(w_out):
                    iw = 2 * ow + kw - 1
                    if not 0 <= iw < w_in:
                        continue
                    T[k * n_out + oh * w_out + ow, ih * w_in + iw] = 1.0
    return jnp.asarray(T, dtype=jnp.bfloat16)


# ----------------------------------------------------------------------------
# The single fused kernel (one batch element per grid step).
# ----------------------------------------------------------------------------
def _fused_kernel(x1_ref, w1_ref, b1_ref,
                  t2_ref, w2_ref, b2_ref,
                  t3_ref, w3_ref, b3_ref,
                  t4_ref, w4_ref, b4_ref,
                  fc_ref, wb_ref, grid_ref, *, n2, n3, n4, H, W):
    # ---- layer 1: one MXU push, K = 16*Cin ---------------------------------
    a = jnp.dot(x1_ref[...], w1_ref[...], preferred_element_type=jnp.float32)
    a = jnp.maximum(a + b1_ref[...], 0.0)                 # (N1, 32) f32

    def conv_tap(act, t_ref, w_ref, b_ref, n_out):
        # Exact 0/1 gather matmul -> all 16 tap slabs stacked along sublanes.
        g = jnp.dot(t_ref[...], act.astype(jnp.bfloat16),
                    preferred_element_type=jnp.float32).astype(jnp.bfloat16)
        cout = w_ref.shape[-1]
        acc = jnp.zeros((n_out, cout), jnp.float32)
        for k in range(16):                               # static unroll
            acc = acc + jnp.dot(g[k * n_out:(k + 1) * n_out, :], w_ref[k],
                                preferred_element_type=jnp.float32)
        return jnp.maximum(acc + b_ref[...], 0.0)

    a = conv_tap(a, t2_ref, w2_ref, b2_ref, n2)           # (N2, 64)
    a = conv_tap(a, t3_ref, w3_ref, b3_ref, n3)           # (N3, 64)
    a = conv_tap(a, t4_ref, w4_ref, b4_ref, n4)           # (N4, 128)

    # ---- AdaptiveAvgPool2d(1) + fused fc_w / fc_b --------------------------
    pooled = (jnp.sum(a, axis=0, keepdims=True) * (1.0 / n4)).astype(jnp.bfloat16)
    y = jnp.dot(pooled, fc_ref[...], preferred_element_type=jnp.float32)  # (1, 6)
    wb_ref[...] = y                                       # [W00 W01 W10 W11 b0 b1]

    # ---- aff_flow grid: in-kernel iota, lane-dense (2, H*W) store ----------
    flat = lax.broadcasted_iota(jnp.int32, (1, H * W), 1).astype(jnp.float32)
    hh = jnp.floor((flat + 0.5) * (1.0 / W))              # exact row index
    ww = flat - hh * W
    xoff = hh - (H - 1) / 2.0
    yoff = ww - (W - 1) / 2.0
    row0 = y[0:1, 0:1] * xoff + y[0:1, 1:2] * yoff + y[0:1, 4:5]
    row1 = y[0:1, 2:3] * xoff + y[0:1, 3:4] * yoff + y[0:1, 5:6]
    grid_ref[...] = jnp.concatenate([row0, row1], axis=0)


# ----------------------------------------------------------------------------
# One-time parameter prep (weight re-layout, gather matrices, bf16 casts).
# ----------------------------------------------------------------------------
def prepare_params(params, H, W):
    assert H % 16 == 0 and W % 16 == 0, "4 stride-2 layers need H, W % 16 == 0"
    sizes = [(H >> (i + 1), W >> (i + 1)) for i in range(4)]  # per-layer output
    out = {}
    # layer 1: (Cout, Cin, 4, 4) -> (16*Cin, Cout), row order (kh, kw, ci).
    w = params["w0"]
    out["w1"] = (jnp.transpose(w, (2, 3, 1, 0))
                 .reshape(16 * w.shape[1], w.shape[0]).astype(jnp.bfloat16))
    out["b1"] = params["b0"].reshape(1, -1).astype(jnp.float32)
    # layers 2..4: per-tap weights + gather matrices.
    in_hw = sizes[0]
    for i in range(1, 4):
        w = params[f"w{i}"]
        out[f"T{i+1}"] = _sel_matrix(in_hw[0], in_hw[1], sizes[i][0], sizes[i][1])
        out[f"w{i+1}"] = (jnp.transpose(w, (2, 3, 1, 0))
                          .reshape(16, w.shape[1], w.shape[0]).astype(jnp.bfloat16))
        out[f"b{i+1}"] = params[f"b{i}"].reshape(1, -1).astype(jnp.float32)
        in_hw = sizes[i]
    # fc_w (4, C4) and fc_b (2, C4) fused into one (C4, 6) matrix.
    out["fc"] = (jnp.concatenate([params["fcw"], params["fcb"]], axis=0)
                 .T.astype(jnp.bfloat16))
    return out


# ----------------------------------------------------------------------------
# Full AffineSteam forward: ONE pallas_call.
# ----------------------------------------------------------------------------
def affine_steam_forward(x_nchw, prepped):
    B, C, H, W = x_nchw.shape
    n = [(H >> (i + 1)) * (W >> (i + 1)) for i in range(4)]      # N1..N4
    x = jnp.transpose(x_nchw, (0, 2, 3, 1))                      # NCHW -> NHWC
    x1 = _im2col_l1(x).astype(jnp.bfloat16)                      # (B, N1, 16*C)
    c1 = prepped["w1"].shape[1]
    c2 = prepped["w2"].shape[2]
    c3 = prepped["w3"].shape[2]
    c4 = prepped["w4"].shape[2]

    kernel = functools.partial(_fused_kernel, n2=n[1], n3=n[2], n4=n[3], H=H, W=W)
    wb, grid_flat = pl.pallas_call(
        kernel,
        out_shape=(jax.ShapeDtypeStruct((B, 1, 6), jnp.float32),
                   jax.ShapeDtypeStruct((B, 2, H * W), jnp.float32)),
        grid=(B,),
        in_specs=[
            pl.BlockSpec((None, n[0], 16 * C), lambda b: (b, 0, 0)),   # per-batch LHS
            pl.BlockSpec((16 * C, c1), lambda b: (0, 0)),              # resident weights
            pl.BlockSpec((1, c1), lambda b: (0, 0)),
            pl.BlockSpec((16 * n[1], n[0]), lambda b: (0, 0)),
            pl.BlockSpec((16, c1, c2), lambda b: (0, 0, 0)),
            pl.BlockSpec((1, c2), lambda b: (0, 0)),
            pl.BlockSpec((16 * n[2], n[1]), lambda b: (0, 0)),
            pl.BlockSpec((16, c2, c3), lambda b: (0, 0, 0)),
            pl.BlockSpec((1, c3), lambda b: (0, 0)),
            pl.BlockSpec((16 * n[3], n[2]), lambda b: (0, 0)),
            pl.BlockSpec((16, c3, c4), lambda b: (0, 0, 0)),
            pl.BlockSpec((1, c4), lambda b: (0, 0)),
            pl.BlockSpec((c4, 6), lambda b: (0, 0)),
        ],
        out_specs=[
            pl.BlockSpec((None, 1, 6), lambda b: (b, 0, 0)),
            pl.BlockSpec((None, 2, H * W), lambda b: (b, 0, 0)),
        ],
        compiler_params=pltpu.CompilerParams(
            dimension_semantics=("parallel",),            # megacore on v7x
        ),
    )(x1, prepped["w1"], prepped["b1"],
      prepped["T2"], prepped["w2"], prepped["b2"],
      prepped["T3"], prepped["w3"], prepped["b3"],
      prepped["T4"], prepped["w4"], prepped["b4"],
      prepped["fc"])

    y = wb.reshape(B, 6)
    Wmat = y[:, :4].reshape(B, 2, 2)
    bvec = y[:, 4:6]
    grid = grid_flat.reshape(B, 2, H, W)                  # free row-major reshape
    return Wmat, bvec, grid


forward = jax.jit(affine_steam_forward)


# ----------------------------------------------------------------------------
# Pure-JAX reference (bf16 matmul inputs / f32 accumulate, like the kernel).
# ----------------------------------------------------------------------------
def reference_forward(x_nchw, params):
    x = x_nchw
    for i in range(4):
        w = params[f"w{i}"]
        b = params[f"b{i}"]
        x = lax.conv_general_dilated(
            x.astype(jnp.bfloat16), w.astype(jnp.bfloat16), (2, 2),
            [(1, 1), (1, 1)], dimension_numbers=("NCHW", "OIHW", "NCHW"),
            preferred_element_type=jnp.float32)
        x = jnp.maximum(x + b[None, :, None, None], 0.0)
    pooled = jnp.mean(x, axis=(2, 3)).astype(jnp.bfloat16)
    Wmat = jnp.dot(pooled, params["fcw"].T.astype(jnp.bfloat16),
                   preferred_element_type=jnp.float32).reshape(-1, 2, 2)
    bvec = jnp.dot(pooled, params["fcb"].T.astype(jnp.bfloat16),
                   preferred_element_type=jnp.float32).reshape(-1, 2)
    H, W = x_nchw.shape[2], x_nchw.shape[3]
    xr = (jnp.arange(H, dtype=jnp.float32) - (H - 1) / 2.0).reshape(1, H, 1, 1)
    yr = (jnp.arange(W, dtype=jnp.float32) - (W - 1) / 2.0).reshape(1, 1, W, 1)
    wx = Wmat[:, :, 0].reshape(-1, 1, 1, 2)
    wy = Wmat[:, :, 1].reshape(-1, 1, 1, 2)
    g = xr * wx + yr * wy + bvec.reshape(-1, 1, 1, 2)
    return Wmat, bvec, jnp.transpose(g, (0, 3, 1, 2))


def init_params(key, nc=4, nf=32):
    keys = jax.random.split(key, 11)
    chans = [(nc, nf), (nf, 2 * nf), (2 * nf, 2 * nf), (2 * nf, 4 * nf)]
    params = {}
    for i, (cin, cout) in enumerate(chans):
        params[f"w{i}"] = 0.1 * jax.random.normal(
            keys[2 * i], (cout, cin, 4, 4), jnp.float32)
        params[f"b{i}"] = 0.01 * jax.random.normal(
            keys[2 * i + 1], (cout,), jnp.float32)
    params["fcw"] = 0.1 * jax.random.normal(keys[8], (2 * 2, 4 * nf), jnp.float32)
    params["fcb"] = 0.1 * jax.random.normal(keys[9], (1 * 2, 4 * nf), jnp.float32)
    return params, keys[10]


if __name__ == "__main__":
    key = jax.random.PRNGKey(0)
    params, xkey = init_params(key, nc=4, nf=32)
    x = jax.random.normal(xkey, (2, 4, 16, 16), jnp.float32)   # NCHW like PyTorch

    prepped = prepare_params(params, 16, 16)   # hoisted one-time weight re-layout
    Wmat, bvec, grid = forward(x, prepped)
    jax.block_until_ready((Wmat, bvec, grid))

    Wr, br, gr = reference_forward(x, params)
    assert Wmat.shape == (2, 2, 2) and bvec.shape == (2, 2)
    assert grid.shape == (2, 2, 16, 16)
    assert jnp.allclose(Wmat, Wr, atol=1e-2, rtol=1e-2)
    assert jnp.allclose(bvec, br, atol=1e-2, rtol=1e-2)
    assert jnp.allclose(grid, gr, atol=2e-2, rtol=1e-2)

    print("KERNEL_OK")
</pallas_src>

<mosaic_0001>
module attributes {stable_mosaic.version = 11 : i64} {
  func.func @_fused_kernel(%arg0: i32, %arg1: memref<1x64x64xbf16, #tpu.memory_space<vmem>>, %arg2: memref<64x32xbf16, #tpu.memory_space<vmem>>, %arg3: memref<1x32xf32, #tpu.memory_space<vmem>>, %arg4: memref<256x64xbf16, #tpu.memory_space<vmem>>, %arg5: memref<16x32x64xbf16, #tpu.memory_space<vmem>>, %arg6: memref<1x64xf32, #tpu.memory_space<vmem>>, %arg7: memref<64x16xbf16, #tpu.memory_space<vmem>>, %arg8: memref<16x64x64xbf16, #tpu.memory_space<vmem>>, %arg9: memref<1x64xf32, #tpu.memory_space<vmem>>, %arg10: memref<16x4xbf16, #tpu.memory_space<vmem>>, %arg11: memref<16x64x128xbf16, #tpu.memory_space<vmem>>, %arg12: memref<1x128xf32, #tpu.memory_space<vmem>>, %arg13: memref<128x6xbf16, #tpu.memory_space<vmem>>, %arg14: memref<1x1x6xf32, #tpu.memory_space<vmem>>, %arg15: memref<1x2x256xf32, #tpu.memory_space<vmem>>) attributes {dimension_semantics = [#tpu.dimension_semantics<parallel>], iteration_bounds = array<i64: 2>, scalar_prefetch = 0 : i64, scratch_operands = 0 : i64, tpu.core_type = #tpu.core_type<tc>, window_params = [{transform_indices = @transform_0, window_bounds = array<i64: 1, 64, 64>}, {pipeline_mode = #tpu.pipeline_mode<synchronous>, transform_indices = @transform_1, window_bounds = array<i64: 64, 32>}, {pipeline_mode = #tpu.pipeline_mode<synchronous>, transform_indices = @transform_2, window_bounds = array<i64: 1, 32>}, {pipeline_mode = #tpu.pipeline_mode<synchronous>, transform_indices = @transform_3, window_bounds = array<i64: 256, 64>}, {pipeline_mode = #tpu.pipeline_mode<synchronous>, transform_indices = @transform_4, window_bounds = array<i64: 16, 32, 64>}, {pipeline_mode = #tpu.pipeline_mode<synchronous>, transform_indices = @transform_5, window_bounds = array<i64: 1, 64>}, {pipeline_mode = #tpu.pipeline_mode<synchronous>, transform_indices = @transform_6, window_bounds = array<i64: 64, 16>}, {pipeline_mode = #tpu.pipeline_mode<synchronous>, transform_indices = @transform_7, window_bounds = array<i64: 16, 64, 64>}, {pipeline_mode = #tpu.pipeline_mode<synchronous>, transform_indices = @transform_8, window_bounds = array<i64: 1, 64>}, {pipeline_mode = #tpu.pipeline_mode<synchronous>, transform_indices = @transform_9, window_bounds = array<i64: 16, 4>}, {pipeline_mode = #tpu.pipeline_mode<synchronous>, transform_indices = @transform_10, window_bounds = array<i64: 16, 64, 128>}, {pipeline_mode = #tpu.pipeline_mode<synchronous>, transform_indices = @transform_11, window_bounds = array<i64: 1, 128>}, {pipeline_mode = #tpu.pipeline_mode<synchronous>, transform_indices = @transform_12, window_bounds = array<i64: 128, 6>}, {transform_indices = @transform_13, window_bounds = array<i64: 1, 1, 6>}, {transform_indices = @transform_14, window_bounds = array<i64: 1, 2, 256>}]} {
    %c0 = arith.constant 0 : index
    %c0_0 = arith.constant 0 : index
    %c0_1 = arith.constant 0 : index
    %0 = vector.load %arg1[%c0, %c0_0, %c0_1] : memref<1x64x64xbf16, #tpu.memory_space<vmem>>, vector<1x64x64xbf16>
    %1 = vector.shape_cast %0 : vector<1x64x64xbf16> to vector<64x64xbf16>
    %c0_2 = arith.constant 0 : index
    %c0_3 = arith.constant 0 : index
    %2 = vector.load %arg2[%c0_2, %c0_3] : memref<64x32xbf16, #tpu.memory_space<vmem>>, vector<64x32xbf16>
    %cst = arith.constant dense<0.000000e+00> : vector<64x32xf32>
    %3 = tpu.matmul %1, %2, %cst {dimension_numbers = #tpu.dot_dimension_numbers<[1], [0], [0], [1], [0, 0, 1, 1], [], []>} : vector<64x64xbf16>, vector<64x32xbf16>, vector<64x32xf32> -> vector<64x32xf32>
    %c0_4 = arith.constant 0 : index
    %c0_5 = arith.constant 0 : index
    %4 = vector.load %arg3[%c0_4, %c0_5] : memref<1x32xf32, #tpu.memory_space<vmem>>, vector<1x32xf32>
    %5 = vector.broadcast %4 : vector<1x32xf32> to vector<64x32xf32>
    %6 = arith.addf %3, %5 : vector<64x32xf32>
    %cst_6 = arith.constant 0.000000e+00 : f32
    %7 = vector.broadcast %cst_6 : f32 to vector<64x32xf32>
    %8 = arith.maximumf %6, %7 : vector<64x32xf32>
    %c0_7 = arith.constant 0 : index
    %c0_8 = arith.constant 0 : index
    %9 = vector.load %arg4[%c0_7, %c0_8] : memref<256x64xbf16, #tpu.memory_space<vmem>>, vector<256x64xbf16>
    %10 = arith.truncf %8 : vector<64x32xf32> to vector<64x32xbf16>
    %cst_9 = arith.constant dense<0.000000e+00> : vector<256x32xf32>
    %11 = tpu.matmul %9, %10, %cst_9 {dimension_numbers = #tpu.dot_dimension_numbers<[1], [0], [0], [1], [0, 0, 1, 1], [], []>} : vector<256x64xbf16>, vector<64x32xbf16>, vector<256x32xf32> -> vector<256x32xf32>
    %12 = arith.truncf %11 : vector<256x32xf32> to vector<256x32xbf16>
    %cst_10 = arith.constant 0.000000e+00 : f32
    %13 = vector.broadcast %cst_10 : f32 to vector<16x64xf32>
    %14 = vector.extract_strided_slice %12 {offsets = [0, 0], sizes = [16, 32], strides = [1, 1]} : vector<256x32xbf16> to vector<16x32xbf16>
    %c0_11 = arith.constant 0 : index
    %c0_12 = arith.constant 0 : index
    %c0_13 = arith.constant 0 : index
    %15 = vector.load %arg5[%c0_11, %c0_12, %c0_13] : memref<16x32x64xbf16, #tpu.memory_space<vmem>>, vector<1x32x64xbf16>
    %16 = vector.shape_cast %15 : vector<1x32x64xbf16> to vector<32x64xbf16>
    %cst_14 = arith.constant dense<0.000000e+00> : vector<16x64xf32>
    %17 = tpu.matmul %14, %16, %cst_14 {dimension_numbers = #tpu.dot_dimension_numbers<[1], [0], [0], [1], [0, 0, 1, 1], [], []>} : vector<16x32xbf16>, vector<32x64xbf16>, vector<16x64xf32> -> vector<16x64xf32>
    %18 = arith.addf %13, %17 : vector<16x64xf32>
    %19 = vector.extract_strided_slice %12 {offsets = [16, 0], sizes = [16, 32], strides = [1, 1]} : vector<256x32xbf16> to vector<16x32xbf16>
    %c1 = arith.constant 1 : index
    %c0_15 = arith.constant 0 : index
    %c0_16 = arith.constant 0 : index
    %20 = vector.load %arg5[%c1, %c0_15, %c0_16] : memref<16x32x64xbf16, #tpu.memory_space<vmem>>, vector<1x32x64xbf16>
    %21 = vector.shape_cast %20 : vector<1x32x64xbf16> to vector<32x64xbf16>
    %cst_17 = arith.constant dense<0.000000e+00> : vector<16x64xf32>
    %22 = tpu.matmul %19, %21, %cst_17 {dimension_numbers = #tpu.dot_dimension_numbers<[1], [0], [0], [1], [0, 0, 1, 1], [], []>} : vector<16x32xbf16>, vector<32x64xbf16>, vector<16x64xf32> -> vector<16x64xf32>
    %23 = arith.addf %18, %22 : vector<16x64xf32>
    %24 = vector.extract_strided_slice %12 {offsets = [32, 0], sizes = [16, 32], strides = [1, 1]} : vector<256x32xbf16> to vector<16x32xbf16>
    %c2 = arith.constant 2 : index
    %c0_18 = arith.constant 0 : index
    %c0_19 = arith.constant 0 : index
    %25 = vector.load %arg5[%c2, %c0_18, %c0_19] : memref<16x32x64xbf16, #tpu.memory_space<vmem>>, vector<1x32x64xbf16>
    %26 = vector.shape_cast %25 : vector<1x32x64xbf16> to vector<32x64xbf16>
    %cst_20 = arith.constant dense<0.000000e+00> : vector<16x64xf32>
    %27 = tpu.matmul %24, %26, %cst_20 {dimension_numbers = #tpu.dot_dimension_numbers<[1], [0], [0], [1], [0, 0, 1, 1], [], []>} : vector<16x32xbf16>, vector<32x64xbf16>, vector<16x64xf32> -> vector<16x64xf32>
    %28 = arith.addf %23, %27 : vector<16x64xf32>
    %29 = vector.extract_strided_slice %12 {offsets = [48, 0], sizes = [16, 32], strides = [1, 1]} : vector<256x32xbf16> to vector<16x32xbf16>
    %c3 = arith.constant 3 : index
    %c0_21 = arith.constant 0 : index
    %c0_22 = arith.constant 0 : index
    %30 = vector.load %arg5[%c3, %c0_21, %c0_22] : memref<16x32x64xbf16, #tpu.memory_space<vmem>>, vector<1x32x64xbf16>
    %31 = vector.shape_cast %30 : vector<1x32x64xbf16> to vector<32x64xbf16>
    %cst_23 = arith.constant dense<0.000000e+00> : vector<16x64xf32>
    %32 = tpu.matmul %29, %31, %cst_23 {dimension_numbers = #tpu.dot_dimension_numbers<[1], [0], [0], [1], [0, 0, 1, 1], [], []>} : vector<16x32xbf16>, vector<32x64xbf16>, vector<16x64xf32> -> vector<16x64xf32>
    %33 = arith.addf %28, %32 : vector<16x64xf32>
    %34 = vector.extract_strided_slice %12 {offsets = [64, 0], sizes = [16, 32], strides = [1, 1]} : vector<256x32xbf16> to vector<16x32xbf16>
    %c4 = arith.constant 4 : index
    %c0_24 = arith.constant 0 : index
    %c0_25 = arith.constant 0 : index
    %35 = vector.load %arg5[%c4, %c0_24, %c0_25] : memref<16x32x64xbf16, #tpu.memory_space<vmem>>, vector<1x32x64xbf16>
    %36 = vector.shape_cast %35 : vector<1x32x64xbf16> to vector<32x64xbf16>
    %cst_26 = arith.constant dense<0.000000e+00> : vector<16x64xf32>
    %37 = tpu.matmul %34, %36, %cst_26 {dimension_numbers = #tpu.dot_dimension_numbers<[1], [0], [0], [1], [0, 0, 1, 1], [], []>} : vector<16x32xbf16>, vector<32x64xbf16>, vector<16x64xf32> -> vector<16x64xf32>
    %38 = arith.addf %33, %37 : vector<16x64xf32>
    %39 = vector.extract_strided_slice %12 {offsets = [80, 0], sizes = [16, 32], strides = [1, 1]} : vector<256x32xbf16> to vector<16x32xbf16>
    %c5 = arith.constant 5 : index
    %c0_27 = arith.constant 0 : index
    %c0_28 = arith.constant 0 : index
    %40 = vector.load %arg5[%c5, %c0_27, %c0_28] : memref<16x32x64xbf16, #tpu.memory_space<vmem>>, vector<1x32x64xbf16>
    %41 = vector.shape_cast %40 : vector<1x32x64xbf16> to vector<32x64xbf16>
    %cst_29 = arith.constant dense<0.000000e+00> : vector<16x64xf32>
    %42 = tpu.matmul %39, %41, %cst_29 {dimension_numbers = #tpu.dot_dimension_numbers<[1], [0], [0], [1], [0, 0, 1, 1], [], []>} : vector<16x32xbf16>, vector<32x64xbf16>, vector<16x64xf32> -> vector<16x64xf32>
    %43 = arith.addf %38, %42 : vector<16x64xf32>
    %44 = vector.extract_strided_slice %12 {offsets = [96, 0], sizes = [16, 32], strides = [1, 1]} : vector<256x32xbf16> to vector<16x32xbf16>
    %c6 = arith.constant 6 : index
    %c0_30 = arith.constant 0 : index
    %c0_31 = arith.constant 0 : index
    %45 = vector.load %arg5[%c6, %c0_30, %c0_31] : memref<16x32x64xbf16, #tpu.memory_space<vmem>>, vector<1x32x64xbf16>
    %46 = vector.shape_cast %45 : vector<1x32x64xbf16> to vector<32x64xbf16>
    %cst_32 = arith.constant dense<0.000000e+00> : vector<16x64xf32>
    %47 = tpu.matmul %44, %46, %cst_32 {dimension_numbers = #tpu.dot_dimension_numbers<[1], [0], [0], [1], [0, 0, 1, 1], [], []>} : vector<16x32xbf16>, vector<32x64xbf16>, vector<16x64xf32> -> vector<16x64xf32>
    %48 = arith.addf %43, %47 : vector<16x64xf32>
    %49 = vector.extract_strided_slice %12 {offsets = [112, 0], sizes = [16, 32], strides = [1, 1]} : vector<256x32xbf16> to vector<16x32xbf16>
    %c7 = arith.constant 7 : index
    %c0_33 = arith.constant 0 : index
    %c0_34 = arith.constant 0 : index
    %50 = vector.load %arg5[%c7, %c0_33, %c0_34] : memref<16x32x64xbf16, #tpu.memory_space<vmem>>, vector<1x32x64xbf16>
    %51 = vector.shape_cast %50 : vector<1x32x64xbf16> to vector<32x64xbf16>
    %cst_35 = arith.constant dense<0.000000e+00> : vector<16x64xf32>
    %52 = tpu.matmul %49, %51, %cst_35 {dimension_numbers = #tpu.dot_dimension_numbers<[1], [0], [0], [1], [0, 0, 1, 1], [], []>} : vector<16x32xbf16>, vector<32x64xbf16>, vector<16x64xf32> -> vector<16x64xf32>
    %53 = arith.addf %48, %52 : vector<16x64xf32>
    %54 = vector.extract_strided_slice %12 {offsets = [128, 0], sizes = [16, 32], strides = [1, 1]} : vector<256x32xbf16> to vector<16x32xbf16>
    %c8 = arith.constant 8 : index
    %c0_36 = arith.constant 0 : index
    %c0_37 = arith.constant 0 : index
    %55 = vector.load %arg5[%c8, %c0_36, %c0_37] : memref<16x32x64xbf16, #tpu.memory_space<vmem>>, vector<1x32x64xbf16>
    %56 = vector.shape_cast %55 : vector<1x32x64xbf16> to vector<32x64xbf16>
    %cst_38 = arith.constant dense<0.000000e+00> : vector<16x64xf32>
    %57 = tpu.matmul %54, %56, %cst_38 {dimension_numbers = #tpu.dot_dimension_numbers<[1], [0], [0], [1], [0, 0, 1, 1], [], []>} : vector<16x32xbf16>, vector<32x64xbf16>, vector<16x64xf32> -> vector<16x64xf32>
    %58 = arith.addf %53, %57 : vector<16x64xf32>
    %59 = vector.extract_strided_slice %12 {offsets = [144, 0], sizes = [16, 32], strides = [1, 1]} : vector<256x32xbf16> to vector<16x32xbf16>
    %c9 = arith.constant 9 : index
    %c0_39 = arith.constant 0 : index
    %c0_40 = arith.constant 0 : index
    %60 = vector.load %arg5[%c9, %c0_39, %c0_40] : memref<16x32x64xbf16, #tpu.memory_space<vmem>>, vector<1x32x64xbf16>
    %61 = vector.shape_cast %60 : vector<1x32x64xbf16> to vector<32x64xbf16>
    %cst_41 = arith.constant dense<0.000000e+00> : vector<16x64xf32>
    %62 = tpu.matmul %59, %61, %cst_41 {dimension_numbers = #tpu.dot_dimension_numbers<[1], [0], [0], [1], [0, 0, 1, 1], [], []>} : vector<16x32xbf16>, vector<32x64xbf16>, vector<16x64xf32> -> vector<16x64xf32>
    %63 = arith.addf %58, %62 : vector<16x64xf32>
    %64 = vector.extract_strided_slice %12 {offsets = [160, 0], sizes = [16, 32], strides = [1, 1]} : vector<256x32xbf16> to vector<16x32xbf16>
    %c10 = arith.constant 10 : index
    %c0_42 = arith.constant 0 : index
    %c0_43 = arith.constant 0 : index
    %65 = vector.load %arg5[%c10, %c0_42, %c0_43] : memref<16x32x64xbf16, #tpu.memory_space<vmem>>, vector<1x32x64xbf16>
    %66 = vector.shape_cast %65 : vector<1x32x64xbf16> to vector<32x64xbf16>
    %cst_44 = arith.constant dense<0.000000e+00> : vector<16x64xf32>
    %67 = tpu.matmul %64, %66, %cst_44 {dimension_numbers = #tpu.dot_dimension_numbers<[1], [0], [0], [1], [0, 0, 1, 1], [], []>} : vector<16x32xbf16>, vector<32x64xbf16>, vector<16x64xf32> -> vector<16x64xf32>
    %68 = arith.addf %63, %67 : vector<16x64xf32>
    %69 = vector.extract_strided_slice %12 {offsets = [176, 0], sizes = [16, 32], strides = [1, 1]} : vector<256x32xbf16> to vector<16x32xbf16>
    %c11 = arith.constant 11 : index
    %c0_45 = arith.constant 0 : index
    %c0_46 = arith.constant 0 : index
    %70 = vector.load %arg5[%c11, %c0_45, %c0_46] : memref<16x32x64xbf16, #tpu.memory_space<vmem>>, vector<1x32x64xbf16>
    %71 = vector.shape_cast %70 : vector<1x32x64xbf16> to vector<32x64xbf16>
    %cst_47 = arith.constant dense<0.000000e+00> : vector<16x64xf32>
    %72 = tpu.matmul %69, %71, %cst_47 {dimension_numbers = #tpu.dot_dimension_numbers<[1], [0], [0], [1], [0, 0, 1, 1], [], []>} : vector<16x32xbf16>, vector<32x64xbf16>, vector<16x64xf32> -> vector<16x64xf32>
    %73 = arith.addf %68, %72 : vector<16x64xf32>
    %74 = vector.extract_strided_slice %12 {offsets = [192, 0], sizes = [16, 32], strides = [1, 1]} : vector<256x32xbf16> to vector<16x32xbf16>
    %c12 = arith.constant 12 : index
    %c0_48 = arith.constant 0 : index
    %c0_49 = arith.constant 0 : index
    %75 = vector.load %arg5[%c12, %c0_48, %c0_49] : memref<16x32x64xbf16, #tpu.memory_space<vmem>>, vector<1x32x64xbf16>
    %76 = vector.shape_cast %75 : vector<1x32x64xbf16> to vector<32x64xbf16>
    %cst_50 = arith.constant dense<0.000000e+00> : vector<16x64xf32>
    %77 = tpu.matmul %74, %76, %cst_50 {dimension_numbers = #tpu.dot_dimension_numbers<[1], [0], [0], [1], [0, 0, 1, 1], [], []>} : vector<16x32xbf16>, vector<32x64xbf16>, vector<16x64xf32> -> vector<16x64xf32>
    %78 = arith.addf %73, %77 : vector<16x64xf32>
    %79 = vector.extract_strided_slice %12 {offsets = [208, 0], sizes = [16, 32], strides = [1, 1]} : vector<256x32xbf16> to vector<16x32xbf16>
    %c13 = arith.constant 13 : index
    %c0_51 = arith.constant 0 : index
    %c0_52 = arith.constant 0 : index
    %80 = vector.load %arg5[%c13, %c0_51, %c0_52] : memref<16x32x64xbf16, #tpu.memory_space<vmem>>, vector<1x32x64xbf16>
    %81 = vector.shape_cast %80 : vector<1x32x64xbf16> to vector<32x64xbf16>
    %cst_53 = arith.constant dense<0.000000e+00> : vector<16x64xf32>
    %82 = tpu.matmul %79, %81, %cst_53 {dimension_numbers = #tpu.dot_dimension_numbers<[1], [0], [0], [1], [0, 0, 1, 1], [], []>} : vector<16x32xbf16>, vector<32x64xbf16>, vector<16x64xf32> -> vector<16x64xf32>
    %83 = arith.addf %78, %82 : vector<16x64xf32>
    %84 = vector.extract_strided_slice %12 {offsets = [224, 0], sizes = [16, 32], strides = [1, 1]} : vector<256x32xbf16> to vector<16x32xbf16>
    %c14 = arith.constant 14 : index
    %c0_54 = arith.constant 0 : index
    %c0_55 = arith.constant 0 : index
    %85 = vector.load %arg5[%c14, %c0_54, %c0_55] : memref<16x32x64xbf16, #tpu.memory_space<vmem>>, vector<1x32x64xbf16>
    %86 = vector.shape_cast %85 : vector<1x32x64xbf16> to vector<32x64xbf16>
    %cst_56 = arith.constant dense<0.000000e+00> : vector<16x64xf32>
    %87 = tpu.matmul %84, %86, %cst_56 {dimension_numbers = #tpu.dot_dimension_numbers<[1], [0], [0], [1], [0, 0, 1, 1], [], []>} : vector<16x32xbf16>, vector<32x64xbf16>, vector<16x64xf32> -> vector<16x64xf32>
    %88 = arith.addf %83, %87 : vector<16x64xf32>
    %89 = vector.extract_strided_slice %12 {offsets = [240, 0], sizes = [16, 32], strides = [1, 1]} : vector<256x32xbf16> to vector<16x32xbf16>
    %c15 = arith.constant 15 : index
    %c0_57 = arith.constant 0 : index
    %c0_58 = arith.constant 0 : index
    %90 = vector.load %arg5[%c15, %c0_57, %c0_58] : memref<16x32x64xbf16, #tpu.memory_space<vmem>>, vector<1x32x64xbf16>
    %91 = vector.shape_cast %90 : vector<1x32x64xbf16> to vector<32x64xbf16>
    %cst_59 = arith.constant dense<0.000000e+00> : vector<16x64xf32>
    %92 = tpu.matmul %89, %91, %cst_59 {dimension_numbers = #tpu.dot_dimension_numbers<[1], [0], [0], [1], [0, 0, 1, 1], [], []>} : vector<16x32xbf16>, vector<32x64xbf16>, vector<16x64xf32> -> vector<16x64xf32>
    %93 = arith.addf %88, %92 : vector<16x64xf32>
    %c0_60 = arith.constant 0 : index
    %c0_61 = arith.constant 0 : index
    %94 = vector.load %arg6[%c0_60, %c0_61] : memref<1x64xf32, #tpu.memory_space<vmem>>, vector<1x64xf32>
    %95 = vector.broadcast %94 : vector<1x64xf32> to vector<16x64xf32>
    %96 = arith.addf %93, %95 : vector<16x64xf32>
    %cst_62 = arith.constant 0.000000e+00 : f32
    %97 = vector.broadcast %cst_62 : f32 to vector<16x64xf32>
    %98 = arith.maximumf %96, %97 : vector<16x64xf32>
    %c0_63 = arith.constant 0 : index
    %c0_64 = arith.constant 0 : index
    %99 = vector.load %arg7[%c0_63, %c0_64] : memref<64x16xbf16, #tpu.memory_space<vmem>>, vector<64x16xbf16>
    %100 = arith.truncf %98 : vector<16x64xf32> to vector<16x64xbf16>
    %cst_65 = arith.constant dense<0.000000e+00> : vector<64x64xf32>
    %101 = tpu.matmul %99, %100, %cst_65 {dimension_numbers = #tpu.dot_dimension_numbers<[1], [0], [0], [1], [0, 0, 1, 1], [], []>} : vector<64x16xbf16>, vector<16x64xbf16>, vector<64x64xf32> -> vector<64x64xf32>
    %102 = arith.truncf %101 : vector<64x64xf32> to vector<64x64xbf16>
    %cst_66 = arith.constant 0.000000e+00 : f32
    %103 = vector.broadcast %cst_66 : f32 to vector<4x64xf32>
    %104 = vector.extract_strided_slice %102 {offsets = [0, 0], sizes = [4, 64], strides = [1, 1]} : vector<64x64xbf16> to vector<4x64xbf16>
    %c0_67 = arith.constant 0 : index
    %c0_68 = arith.constant 0 : index
    %c0_69 = arith.constant 0 : index
    %105 = vector.load %arg8[%c0_67, %c0_68, %c0_69] : memref<16x64x64xbf16, #tpu.memory_space<vmem>>, vector<1x64x64xbf16>
    %106 = vector.shape_cast %105 : vector<1x64x64xbf16> to vector<64x64xbf16>
    %cst_70 = arith.constant dense<0.000000e+00> : vector<4x64xf32>
    %107 = tpu.matmul %104, %106, %cst_70 {dimension_numbers = #tpu.dot_dimension_numbers<[1], [0], [0], [1], [0, 0, 1, 1], [], []>} : vector<4x64xbf16>, vector<64x64xbf16>, vector<4x64xf32> -> vector<4x64xf32>
    %108 = arith.addf %103, %107 : vector<4x64xf32>
    %109 = vector.extract_strided_slice %102 {offsets = [4, 0], sizes = [4, 64], strides = [1, 1]} : vector<64x64xbf16> to vector<4x64xbf16>
    %c1_71 = arith.constant 1 : index
    %c0_72 = arith.constant 0 : index
    %c0_73 = arith.constant 0 : index
    %110 = vector.load %arg8[%c1_71, %c0_72, %c0_73] : memref<16x64x64xbf16, #tpu.memory_space<vmem>>, vector<1x64x64xbf16>
    %111 = vector.shape_cast %110 : vector<1x64x64xbf16> to vector<64x64xbf16>
    %cst_74 = arith.constant dense<0.000000e+00> : vector<4x64xf32>
    %112 = tpu.matmul %109, %111, %cst_74 {dimension_numbers = #tpu.dot_dimension_numbers<[1], [0], [0], [1], [0, 0, 1, 1], [], []>} : vector<4x64xbf16>, vector<64x64xbf16>, vector<4x64xf32> -> vector<4x64xf32>
    %113 = arith.addf %108, %112 : vector<4x64xf32>
    %114 = vector.extract_strided_slice %102 {offsets = [8, 0], sizes = [4, 64], strides = [1, 1]} : vector<64x64xbf16> to vector<4x64xbf16>
    %c2_75 = arith.constant 2 : index
    %c0_76 = arith.constant 0 : index
    %c0_77 = arith.constant 0 : index
    %115 = vector.load %arg8[%c2_75, %c0_76, %c0_77] : memref<16x64x64xbf16, #tpu.memory_space<vmem>>, vector<1x64x64xbf16>
    %116 = vector.shape_cast %115 : vector<1x64x64xbf16> to vector<64x64xbf16>
    %cst_78 = arith.constant dense<0.000000e+00> : vector<4x64xf32>
    %117 = tpu.matmul %114, %116, %cst_78 {dimension_numbers = #tpu.dot_dimension_numbers<[1], [0], [0], [1], [0, 0, 1, 1], [], []>} : vector<4x64xbf16>, vector<64x64xbf16>, vector<4x64xf32> -> vector<4x64xf32>
    %118 = arith.addf %113, %117 : vector<4x64xf32>
    %119 = vector.extract_strided_slice %102 {offsets = [12, 0], sizes = [4, 64], strides = [1, 1]} : vector<64x64xbf16> to vector<4x64xbf16>
    %c3_79 = arith.constant 3 : index
    %c0_80 = arith.constant 0 : index
    %c0_81 = arith.constant 0 : index
    %120 = vector.load %arg8[%c3_79, %c0_80, %c0_81] : memref<16x64x64xbf16, #tpu.memory_space<vmem>>, vector<1x64x64xbf16>
    %121 = vector.shape_cast %120 : vector<1x64x64xbf16> to vector<64x64xbf16>
    %cst_82 = arith.constant dense<0.000000e+00> : vector<4x64xf32>
    %122 = tpu.matmul %119, %121, %cst_82 {dimension_numbers = #tpu.dot_dimension_numbers<[1], [0], [0], [1], [0, 0, 1, 1], [], []>} : vector<4x64xbf16>, vector<64x64xbf16>, vector<4x64xf32> -> vector<4x64xf32>
    %123 = arith.addf %118, %122 : vector<4x64xf32>
    %124 = vector.extract_strided_slice %102 {offsets = [16, 0], sizes = [4, 64], strides = [1, 1]} : vector<64x64xbf16> to vector<4x64xbf16>
    %c4_83 = arith.constant 4 : index
    %c0_84 = arith.constant 0 : index
    %c0_85 = arith.constant 0 : index
    %125 = vector.load %arg8[%c4_83, %c0_84, %c0_85] : memref<16x64x64xbf16, #tpu.memory_space<vmem>>, vector<1x64x64xbf16>
    %126 = vector.shape_cast %125 : vector<1x64x64xbf16> to vector<64x64xbf16>
    %cst_86 = arith.constant dense<0.000000e+00> : vector<4x64xf32>
    %127 = tpu.matmul %124, %126, %cst_86 {dimension_numbers = #tpu.dot_dimension_numbers<[1], [0], [0], [1], [0, 0, 1, 1], [], []>} : vector<4x64xbf16>, vector<64x64xbf16>, vector<4x64xf32> -> vector<4x64xf32>
    %128 = arith.addf %123, %127 : vector<4x64xf32>
    %129 = vector.extract_strided_slice %102 {offsets = [20, 0], sizes = [4, 64], strides = [1, 1]} : vector<64x64xbf16> to vector<4x64xbf16>
    %c5_87 = arith.constant 5 : index
    %c0_88 = arith.constant 0 : index
    %c0_89 = arith.constant 0 : index
    %130 = vector.load %arg8[%c5_87, %c0_88, %c0_89] : memref<16x64x64xbf16, #tpu.memory_space<vmem>>, vector<1x64x64xbf16>
    %131 = vector.shape_cast %130 : vector<1x64x64xbf16> to vector<64x64xbf16>
    %cst_90 = arith.constant dense<0.000000e+00> : vector<4x64xf32>
    %132 = tpu.matmul %129, %131, %cst_90 {dimension_numbers = #tpu.dot_dimension_numbers<[1], [0], [0], [1], [0, 0, 1, 1], [], []>} : vector<4x64xbf16>, vector<64x64xbf16>, vector<4x64xf32> -> vector<4x64xf32>
    %133 = arith.addf %128, %132 : vector<4x64xf32>
    %134 = vector.extract_strided_slice %102 {offsets = [24, 0], sizes = [4, 64], strides = [1, 1]} : vector<64x64xbf16> to vector<4x64xbf16>
    %c6_91 = arith.constant 6 : index
    %c0_92 = arith.constant 0 : index
    %c0_93 = arith.constant 0 : index
    %135 = vector.load %arg8[%c6_91, %c0_92, %c0_93] : memref<16x64x64xbf16, #tpu.memory_space<vmem>>, vector<1x64x64xbf16>
    %136 = vector.shape_cast %135 : vector<1x64x64xbf16> to vector<64x64xbf16>
    %cst_94 = arith.constant dense<0.000000e+00> : vector<4x64xf32>
    %137 = tpu.matmul %134, %136, %cst_94 {dimension_numbers = #tpu.dot_dimension_numbers<[1], [0], [0], [1], [0, 0, 1, 1], [], []>} : vector<4x64xbf16>, vector<64x64xbf16>, vector<4x64xf32> -> vector<4x64xf32>
    %138 = arith.addf %133, %137 : vector<4x64xf32>
    %139 = vector.extract_strided_slice %102 {offsets = [28, 0], sizes = [4, 64], strides = [1, 1]} : vector<64x64xbf16> to vector<4x64xbf16>
    %c7_95 = arith.constant 7 : index
    %c0_96 = arith.constant 0 : index
    %c0_97 = arith.constant 0 : index
    %140 = vector.load %arg8[%c7_95, %c0_96, %c0_97] : memref<16x64x64xbf16, #tpu.memory_space<vmem>>, vector<1x64x64xbf16>
    %141 = vector.shape_cast %140 : vector<1x64x64xbf16> to vector<64x64xbf16>
    %cst_98 = arith.constant dense<0.000000e+00> : vector<4x64xf32>
    %142 = tpu.matmul %139, %141, %cst_98 {dimension_numbers = #tpu.dot_dimension_numbers<[1], [0], [0], [1], [0, 0, 1, 1], [], []>} : vector<4x64xbf16>, vector<64x64xbf16>, vector<4x64xf32> -> vector<4x64xf32>
    %143 = arith.addf %138, %142 : vector<4x64xf32>
    %144 = vector.extract_strided_slice %102 {offsets = [32, 0], sizes = [4, 64], strides = [1, 1]} : vector<64x64xbf16> to vector<4x64xbf16>
    %c8_99 = arith.constant 8 : index
    %c0_100 = arith.constant 0 : index
    %c0_101 = arith.constant 0 : index
    %145 = vector.load %arg8[%c8_99, %c0_100, %c0_101] : memref<16x64x64xbf16, #tpu.memory_space<vmem>>, vector<1x64x64xbf16>
    %146 = vector.shape_cast %145 : vector<1x64x64xbf16> to vector<64x64xbf16>
    %cst_102 = arith.constant dense<0.000000e+00> : vector<4x64xf32>
    %147 = tpu.matmul %144, %146, %cst_102 {dimension_numbers = #tpu.dot_dimension_numbers<[1], [0], [0], [1], [0, 0, 1, 1], [], []>} : vector<4x64xbf16>, vector<64x64xbf16>, vector<4x64xf32> -> vector<4x64xf32>
    %148 = arith.addf %143, %147 : vector<4x64xf32>
    %149 = vector.extract_strided_slice %102 {offsets = [36, 0], sizes = [4, 64], strides = [1, 1]} : vector<64x64xbf16> to vector<4x64xbf16>
    %c9_103 = arith.constant 9 : index
    %c0_104 = arith.constant 0 : index
    %c0_105 = arith.constant 0 : index
    %150 = vector.load %arg8[%c9_103, %c0_104, %c0_105] : memref<16x64x64xbf16, #tpu.memory_space<vmem>>, vector<1x64x64xbf16>
    %151 = vector.shape_cast %150 : vector<1x64x64xbf16> to vector<64x64xbf16>
    %cst_106 = arith.constant dense<0.000000e+00> : vector<4x64xf32>
    %152 = tpu.matmul %149, %151, %cst_106 {dimension_numbers = #tpu.dot_dimension_numbers<[1], [0], [0], [1], [0, 0, 1, 1], [], []>} : vector<4x64xbf16>, vector<64x64xbf16>, vector<4x64xf32> -> vector<4x64xf32>
    %153 = arith.addf %148, %152 : vector<4x64xf32>
    %154 = vector.extract_strided_slice %102 {offsets = [40, 0], sizes = [4, 64], strides = [1, 1]} : vector<64x64xbf16> to vector<4x64xbf16>
    %c10_107 = arith.constant 10 : index
    %c0_108 = arith.constant 0 : index
    %c0_109 = arith.constant 0 : index
    %155 = vector.load %arg8[%c10_107, %c0_108, %c0_109] : memref<16x64x64xbf16, #tpu.memory_space<vmem>>, vector<1x64x64xbf16>
    %156 = vector.shape_cast %155 : vector<1x64x64xbf16> to vector<64x64xbf16>
    %cst_110 = arith.constant dense<0.000000e+00> : vector<4x64xf32>
    %157 = tpu.matmul %154, %156, %cst_110 {dimension_numbers = #tpu.dot_dimension_numbers<[1], [0], [0], [1], [0, 0, 1, 1], [], []>} : vector<4x64xbf16>, vector<64x64xbf16>, vector<4x64xf32> -> vector<4x64xf32>
    %158 = arith.addf %153, %157 : vector<4x64xf32>
    %159 = vector.extract_strided_slice %102 {offsets = [44, 0], sizes = [4, 64], strides = [1, 1]} : vector<64x64xbf16> to vector<4x64xbf16>
    %c11_111 = arith.constant 11 : index
    %c0_112 = arith.constant 0 : index
    %c0_113 = arith.constant 0 : index
    %160 = vector.load %arg8[%c11_111, %c0_112, %c0_113] : memref<16x64x64xbf16, #tpu.memory_space<vmem>>, vector<1x64x64xbf16>
    %161 = vector.shape_cast %160 : vector<1x64x64xbf16> to vector<64x64xbf16>
    %cst_114 = arith.constant dense<0.000000e+00> : vector<4x64xf32>
    %162 = tpu.matmul %159, %161, %cst_114 {dimension_numbers = #tpu.dot_dimension_numbers<[1], [0], [0], [1], [0, 0, 1, 1], [], []>} : vector<4x64xbf16>, vector<64x64xbf16>, vector<4x64xf32> -> vector<4x64xf32>
    %163 = arith.addf %158, %162 : vector<4x64xf32>
    %164 = vector.extract_strided_slice %102 {offsets = [48, 0], sizes = [4, 64], strides = [1, 1]} : vector<64x64xbf16> to vector<4x64xbf16>
    %c12_115 = arith.constant 12 : index
    %c0_116 = arith.constant 0 : index
    %c0_117 = arith.constant 0 : index
    %165 = vector.load %arg8[%c12_115, %c0_116, %c0_117] : memref<16x64x64xbf16, #tpu.memory_space<vmem>>, vector<1x64x64xbf16>
    %166 = vector.shape_cast %165 : vector<1x64x64xbf16> to vector<64x64xbf16>
    %cst_118 = arith.constant dense<0.000000e+00> : vector<4x64xf32>
    %167 = tpu.matmul %164, %166, %cst_118 {dimension_numbers = #tpu.dot_dimension_numbers<[1], [0], [0], [1], [0, 0, 1, 1], [], []>} : vector<4x64xbf16>, vector<64x64xbf16>, vector<4x64xf32> -> vector<4x64xf32>
    %168 = arith.addf %163, %167 : vector<4x64xf32>
    %169 = vector.extract_strided_slice %102 {offsets = [52, 0], sizes = [4, 64], strides = [1, 1]} : vector<64x64xbf16> to vector<4x64xbf16>
    %c13_119 = arith.constant 13 : index
    %c0_120 = arith.constant 0 : index
    %c0_121 = arith.constant 0 : index
    %170 = vector.load %arg8[%c13_119, %c0_120, %c0_121] : memref<16x64x64xbf16, #tpu.memory_space<vmem>>, vector<1x64x64xbf16>
    %171 = vector.shape_cast %170 : vector<1x64x64xbf16> to vector<64x64xbf16>
    %cst_122 = arith.constant dense<0.000000e+00> : vector<4x64xf32>
    %172 = tpu.matmul %169, %171, %cst_122 {dimension_numbers = #tpu.dot_dimension_numbers<[1], [0], [0], [1], [0, 0, 1, 1], [], []>} : vector<4x64xbf16>, vector<64x64xbf16>, vector<4x64xf32> -> vector<4x64xf32>
    %173 = arith.addf %168, %172 : vector<4x64xf32>
    %174 = vector.extract_strided_slice %102 {offsets = [56, 0], sizes = [4, 64], strides = [1, 1]} : vector<64x64xbf16> to vector<4x64xbf16>
    %c14_123 = arith.constant 14 : index
    %c0_124 = arith.constant 0 : index
    %c0_125 = arith.constant 0 : index
    %175 = vector.load %arg8[%c14_123, %c0_124, %c0_125] : memref<16x64x64xbf16, #tpu.memory_space<vmem>>, vector<1x64x64xbf16>
    %176 = vector.shape_cast %175 : vector<1x64x64xbf16> to vector<64x64xbf16>
    %cst_126 = arith.constant dense<0.000000e+00> : vector<4x64xf32>
    %177 = tpu.matmul %174, %176, %cst_126 {dimension_numbers = #tpu.dot_dimension_numbers<[1], [0], [0], [1], [0, 0, 1, 1], [], []>} : vector<4x64xbf16>, vector<64x64xbf16>, vector<4x64xf32> -> vector<4x64xf32>
    %178 = arith.addf %173, %177 : vector<4x64xf32>
    %179 = vector.extract_strided_slice %102 {offsets = [60, 0], sizes = [4, 64], strides = [1, 1]} : vector<64x64xbf16> to vector<4x64xbf16>
    %c15_127 = arith.constant 15 : index
    %c0_128 = arith.constant 0 : index
    %c0_129 = arith.constant 0 : index
    %180 = vector.load %arg8[%c15_127, %c0_128, %c0_129] : memref<16x64x64xbf16, #tpu.memory_space<vmem>>, vector<1x64x64xbf16>
    %181 = vector.shape_cast %180 : vector<1x64x64xbf16> to vector<64x64xbf16>
    %cst_130 = arith.constant dense<0.000000e+00> : vector<4x64xf32>
    %182 = tpu.matmul %179, %181, %cst_130 {dimension_numbers = #tpu.dot_dimension_numbers<[1], [0], [0], [1], [0, 0, 1, 1], [], []>} : vector<4x64xbf16>, vector<64x64xbf16>, vector<4x64xf32> -> vector<4x64xf32>
    %183 = arith.addf %178, %182 : vector<4x64xf32>
    %c0_131 = arith.constant 0 : index
    %c0_132 = arith.constant 0 : index
    %184 = vector.load %arg9[%c0_131, %c0_132] : memref<1x64xf32, #tpu.memory_space<vmem>>, vector<1x64xf32>
    %185 = vector.broadcast %184 : vector<1x64xf32> to vector<4x64xf32>
    %186 = arith.addf %183, %185 : vector<4x64xf32>
    %cst_133 = arith.constant 0.000000e+00 : f32
    %187 = vector.broadcast %cst_133 : f32 to vector<4x64xf32>
    %188 = arith.maximumf %186, %187 : vector<4x64xf32>
    %c0_134 = arith.constant 0 : index
    %c0_135 = arith.constant 0 : index
    %189 = vector.load %arg10[%c0_134, %c0_135] : memref<16x4xbf16, #tpu.memory_space<vmem>>, vector<16x4xbf16>
    %190 = arith.truncf %188 : vector<4x64xf32> to vector<4x64xbf16>
    %cst_136 = arith.constant dense<0.000000e+00> : vector<16x64xf32>
    %191 = tpu.matmul %189, %190, %cst_136 {dimension_numbers = #tpu.dot_dimension_numbers<[1], [0], [0], [1], [0, 0, 1, 1], [], []>} : vector<16x4xbf16>, vector<4x64xbf16>, vector<16x64xf32> -> vector<16x64xf32>
    %192 = arith.truncf %191 : vector<16x64xf32> to vector<16x64xbf16>
    %cst_137 = arith.constant 0.000000e+00 : f32
    %193 = vector.broadcast %cst_137 : f32 to vector<1x128xf32>
    %194 = vector.extract_strided_slice %192 {offsets = [0, 0], sizes = [1, 64], strides = [1, 1]} : vector<16x64xbf16> to vector<1x64xbf16>
    %c0_138 = arith.constant 0 : index
    %c0_139 = arith.constant 0 : index
    %c0_140 = arith.constant 0 : index
    %195 = vector.load %arg11[%c0_138, %c0_139, %c0_140] : memref<16x64x128xbf16, #tpu.memory_space<vmem>>, vector<1x64x128xbf16>
    %196 = vector.shape_cast %195 : vector<1x64x128xbf16> to vector<64x128xbf16>
    %cst_141 = arith.constant dense<0.000000e+00> : vector<1x128xf32>
    %197 = tpu.matmul %194, %196, %cst_141 {dimension_numbers = #tpu.dot_dimension_numbers<[1], [0], [0], [1], [0, 0, 1, 1], [], []>} : vector<1x64xbf16>, vector<64x128xbf16>, vector<1x128xf32> -> vector<1x128xf32>
    %198 = arith.addf %193, %197 : vector<1x128xf32>
    %199 = vector.extract_strided_slice %192 {offsets = [1, 0], sizes = [1, 64], strides = [1, 1]} : vector<16x64xbf16> to vector<1x64xbf16>
    %c1_142 = arith.constant 1 : index
    %c0_143 = arith.constant 0 : index
    %c0_144 = arith.constant 0 : index
    %200 = vector.load %arg11[%c1_142, %c0_143, %c0_144] : memref<16x64x128xbf16, #tpu.memory_space<vmem>>, vector<1x64x128xbf16>
    %201 = vector.shape_cast %200 : vector<1x64x128xbf16> to vector<64x128xbf16>
    %cst_145 = arith.constant dense<0.000000e+00> : vector<1x128xf32>
    %202 = tpu.matmul %199, %201, %cst_145 {dimension_numbers = #tpu.dot_dimension_numbers<[1], [0], [0], [1], [0, 0, 1, 1], [], []>} : vector<1x64xbf16>, vector<64x128xbf16>, vector<1x128xf32> -> vector<1x128xf32>
    %203 = arith.addf %198, %202 : vector<1x128xf32>
    %204 = vector.extract_strided_slice %192 {offsets = [2, 0], sizes = [1, 64], strides = [1, 1]} : vector<16x64xbf16> to vector<1x64xbf16>
    %c2_146 = arith.constant 2 : index
    %c0_147 = arith.constant 0 : index
    %c0_148 = arith.constant 0 : index
    %205 = vector.load %arg11[%c2_146, %c0_147, %c0_148] : memref<16x64x128xbf16, #tpu.memory_space<vmem>>, vector<1x64x128xbf16>
    %206 = vector.shape_cast %205 : vector<1x64x128xbf16> to vector<64x128xbf16>
    %cst_149 = arith.constant dense<0.000000e+00> : vector<1x128xf32>
    %207 = tpu.matmul %204, %206, %cst_149 {dimension_numbers = #tpu.dot_dimension_numbers<[1], [0], [0], [1], [0, 0, 1, 1], [], []>} : vector<1x64xbf16>, vector<64x128xbf16>, vector<1x128xf32> -> vector<1x128xf32>
    %208 = arith.addf %203, %207 : vector<1x128xf32>
    %209 = vector.extract_strided_slice %192 {offsets = [3, 0], sizes = [1, 64], strides = [1, 1]} : vector<16x64xbf16> to vector<1x64xbf16>
    %c3_150 = arith.constant 3 : index
    %c0_151 = arith.constant 0 : index
    %c0_152 = arith.constant 0 : index
    %210 = vector.load %arg11[%c3_150, %c0_151, %c0_152] : memref<16x64x128xbf16, #tpu.memory_space<vmem>>, vector<1x64x128xbf16>
    %211 = vector.shape_cast %210 : vector<1x64x128xbf16> to vector<64x128xbf16>
    %cst_153 = arith.constant dense<0.000000e+00> : vector<1x128xf32>
    %212 = tpu.matmul %209, %211, %cst_153 {dimension_numbers = #tpu.dot_dimension_numbers<[1], [0], [0], [1], [0, 0, 1, 1], [], []>} : vector<1x64xbf16>, vector<64x128xbf16>, vector<1x128xf32> -> vector<1x128xf32>
    %213 = arith.addf %208, %212 : vector<1x128xf32>
    %214 = vector.extract_strided_slice %192 {offsets = [4, 0], sizes = [1, 64], strides = [1, 1]} : vector<16x64xbf16> to vector<1x64xbf16>
    %c4_154 = arith.constant 4 : index
    %c0_155 = arith.constant 0 : index
    %c0_156 = arith.constant 0 : index
    %215 = vector.load %arg11[%c4_154, %c0_155, %c0_156] : memref<16x64x128xbf16, #tpu.memory_space<vmem>>, vector<1x64x128xbf16>
    %216 = vector.shape_cast %215 : vector<1x64x128xbf16> to vector<64x128xbf16>
    %cst_157 = arith.constant dense<0.000000e+00> : vector<1x128xf32>
    %217 = tpu.matmul %214, %216, %cst_157 {dimension_numbers = #tpu.dot_dimension_numbers<[1], [0], [0], [1], [0, 0, 1, 1], [], []>} : vector<1x64xbf16>, vector<64x128xbf16>, vector<1x128xf32> -> vector<1x128xf32>
    %218 = arith.addf %213, %217 : vector<1x128xf32>
    %219 = vector.extract_strided_slice %192 {offsets = [5, 0], sizes = [1, 64], strides = [1, 1]} : vector<16x64xbf16> to vector<1x64xbf16>
    %c5_158 = arith.constant 5 : index
    %c0_159 = arith.constant 0 : index
    %c0_160 = arith.constant 0 : index
    %220 = vector.load %arg11[%c5_158, %c0_159, %c0_160] : memref<16x64x128xbf16, #tpu.memory_space<vmem>>, vector<1x64x128xbf16>
    %221 = vector.shape_cast %220 : vector<1x64x128xbf16> to vector<64x128xbf16>
    %cst_161 = arith.constant dense<0.000000e+00> : vector<1x128xf32>
    %222 = tpu.matmul %219, %221, %cst_161 {dimension_numbers = #tpu.dot_dimension_numbers<[1], [0], [0], [1], [0, 0, 1, 1], [], []>} : vector<1x64xbf16>, vector<64x128xbf16>, vector<1x128xf32> -> vector<1x128xf32>
    %223 = arith.addf %218, %222 : vector<1x128xf32>
    %224 = vector.extract_strided_slice %192 {offsets = [6, 0], sizes = [1, 64], strides = [1, 1]} : vector<16x64xbf16> to vector<1x64xbf16>
    %c6_162 = arith.constant 6 : index
    %c0_163 = arith.constant 0 : index
    %c0_164 = arith.constant 0 : index
    %225 = vector.load %arg11[%c6_162, %c0_163, %c0_164] : memref<16x64x128xbf16, #tpu.memory_space<vmem>>, vector<1x64x128xbf16>
    %226 = vector.shape_cast %225 : vector<1x64x128xbf16> to vector<64x128xbf16>
    %cst_165 = arith.constant dense<0.000000e+00> : vector<1x128xf32>
    %227 = tpu.matmul %224, %226, %cst_165 {dimension_numbers = #tpu.dot_dimension_numbers<[1], [0], [0], [1], [0, 0, 1, 1], [], []>} : vector<1x64xbf16>, vector<64x128xbf16>, vector<1x128xf32> -> vector<1x128xf32>
    %228 = arith.addf %223, %227 : vector<1x128xf32>
    %229 = vector.extract_strided_slice %192 {offsets = [7, 0], sizes = [1, 64], strides = [1, 1]} : vector<16x64xbf16> to vector<1x64xbf16>
    %c7_166 = arith.constant 7 : index
    %c0_167 = arith.constant 0 : index
    %c0_168 = arith.constant 0 : index
    %230 = vector.load %arg11[%c7_166, %c0_167, %c0_168] : memref<16x64x128xbf16, #tpu.memory_space<vmem>>, vector<1x64x128xbf16>
    %231 = vector.shape_cast %230 : vector<1x64x128xbf16> to vector<64x128xbf16>
    %cst_169 = arith.constant dense<0.000000e+00> : vector<1x128xf32>
    %232 = tpu.matmul %229, %231, %cst_169 {dimension_numbers = #tpu.dot_dimension_numbers<[1], [0], [0], [1], [0, 0, 1, 1], [], []>} : vector<1x64xbf16>, vector<64x128xbf16>, vector<1x128xf32> -> vector<1x128xf32>
    %233 = arith.addf %228, %232 : vector<1x128xf32>
    %234 = vector.extract_strided_slice %192 {offsets = [8, 0], sizes = [1, 64], strides = [1, 1]} : vector<16x64xbf16> to vector<1x64xbf16>
    %c8_170 = arith.constant 8 : index
    %c0_171 = arith.constant 0 : index
    %c0_172 = arith.constant 0 : index
    %235 = vector.load %arg11[%c8_170, %c0_171, %c0_172] : memref<16x64x128xbf16, #tpu.memory_space<vmem>>, vector<1x64x128xbf16>
    %236 = vector.shape_cast %235 : vector<1x64x128xbf16> to vector<64x128xbf16>
    %cst_173 = arith.constant dense<0.000000e+00> : vector<1x128xf32>
    %237 = tpu.matmul %234, %236, %cst_173 {dimension_numbers = #tpu.dot_dimension_numbers<[1], [0], [0], [1], [0, 0, 1, 1], [], []>} : vector<1x64xbf16>, vector<64x128xbf16>, vector<1x128xf32> -> vector<1x128xf32>
    %238 = arith.addf %233, %237 : vector<1x128xf32>
    %239 = vector.extract_strided_slice %192 {offsets = [9, 0], sizes = [1, 64], strides = [1, 1]} : vector<16x64xbf16> to vector<1x64xbf16>
    %c9_174 = arith.constant 9 : index
    %c0_175 = arith.constant 0 : index
    %c0_176 = arith.constant 0 : index
    %240 = vector.load %arg11[%c9_174, %c0_175, %c0_176] : memref<16x64x128xbf16, #tpu.memory_space<vmem>>, vector<1x64x128xbf16>
    %241 = vector.shape_cast %240 : vector<1x64x128xbf16> to vector<64x128xbf16>
    %cst_177 = arith.constant dense<0.000000e+00> : vector<1x128xf32>
    %242 = tpu.matmul %239, %241, %cst_177 {dimension_numbers = #tpu.dot_dimension_numbers<[1], [0], [0], [1], [0, 0, 1, 1], [], []>} : vector<1x64xbf16>, vector<64x128xbf16>, vector<1x128xf32> -> vector<1x128xf32>
    %243 = arith.addf %238, %242 : vector<1x128xf32>
    %244 = vector.extract_strided_slice %192 {offsets = [10, 0], sizes = [1, 64], strides = [1, 1]} : vector<16x64xbf16> to vector<1x64xbf16>
    %c10_178 = arith.constant 10 : index
    %c0_179 = arith.constant 0 : index
    %c0_180 = arith.constant 0 : index
    %245 = vector.load %arg11[%c10_178, %c0_179, %c0_180] : memref<16x64x128xbf16, #tpu.memory_space<vmem>>, vector<1x64x128xbf16>
    %246 = vector.shape_cast %245 : vector<1x64x128xbf16> to vector<64x128xbf16>
    %cst_181 = arith.constant dense<0.000000e+00> : vector<1x128xf32>
    %247 = tpu.matmul %244, %246, %cst_181 {dimension_numbers = #tpu.dot_dimension_numbers<[1], [0], [0], [1], [0, 0, 1, 1], [], []>} : vector<1x64xbf16>, vector<64x128xbf16>, vector<1x128xf32> -> vector<1x128xf32>
    %248 = arith.addf %243, %247 : vector<1x128xf32>
    %249 = vector.extract_strided_slice %192 {offsets = [11, 0], sizes = [1, 64], strides = [1, 1]} : vector<16x64xbf16> to vector<1x64xbf16>
    %c11_182 = arith.constant 11 : index
    %c0_183 = arith.constant 0 : index
    %c0_184 = arith.constant 0 : index
    %250 = vector.load %arg11[%c11_182, %c0_183, %c0_184] : memref<16x64x128xbf16, #tpu.memory_space<vmem>>, vector<1x64x128xbf16>
    %251 = vector.shape_cast %250 : vector<1x64x128xbf16> to vector<64x128xbf16>
    %cst_185 = arith.constant dense<0.000000e+00> : vector<1x128xf32>
    %252 = tpu.matmul %249, %251, %cst_185 {dimension_numbers = #tpu.dot_dimension_numbers<[1], [0], [0], [1], [0, 0, 1, 1], [], []>} : vector<1x64xbf16>, vector<64x128xbf16>, vector<1x128xf32> -> vector<1x128xf32>
    %253 = arith.addf %248, %252 : vector<1x128xf32>
    %254 = vector.extract_strided_slice %192 {offsets = [12, 0], sizes = [1, 64], strides = [1, 1]} : vector<16x64xbf16> to vector<1x64xbf16>
    %c12_186 = arith.constant 12 : index
    %c0_187 = arith.constant 0 : index
    %c0_188 = arith.constant 0 : index
    %255 = vector.load %arg11[%c12_186, %c0_187, %c0_188] : memref<16x64x128xbf16, #tpu.memory_space<vmem>>, vector<1x64x128xbf16>
    %256 = vector.shape_cast %255 : vector<1x64x128xbf16> to vector<64x128xbf16>
    %cst_189 = arith.constant dense<0.000000e+00> : vector<1x128xf32>
    %257 = tpu.matmul %254, %256, %cst_189 {dimension_numbers = #tpu.dot_dimension_numbers<[1], [0], [0], [1], [0, 0, 1, 1], [], []>} : vector<1x64xbf16>, vector<64x128xbf16>, vector<1x128xf32> -> vector<1x128xf32>
    %258 = arith.addf %253, %257 : vector<1x128xf32>
    %259 = vector.extract_strided_slice %192 {offsets = [13, 0], sizes = [1, 64], strides = [1, 1]} : vector<16x64xbf16> to vector<1x64xbf16>
    %c13_190 = arith.constant 13 : index
    %c0_191 = arith.constant 0 : index
    %c0_192 = arith.constant 0 : index
    %260 = vector.load %arg11[%c13_190, %c0_191, %c0_192] : memref<16x64x128xbf16, #tpu.memory_space<vmem>>, vector<1x64x128xbf16>
    %261 = vector.shape_cast %260 : vector<1x64x128xbf16> to vector<64x128xbf16>
    %cst_193 = arith.constant dense<0.000000e+00> : vector<1x128xf32>
    %262 = tpu.matmul %259, %261, %cst_193 {dimension_numbers = #tpu.dot_dimension_numbers<[1], [0], [0], [1], [0, 0, 1, 1], [], []>} : vector<1x64xbf16>, vector<64x128xbf16>, vector<1x128xf32> -> vector<1x128xf32>
    %263 = arith.addf %258, %262 : vector<1x128xf32>
    %264 = vector.extract_strided_slice %192 {offsets = [14, 0], sizes = [1, 64], strides = [1, 1]} : vector<16x64xbf16> to vector<1x64xbf16>
    %c14_194 = arith.constant 14 : index
    %c0_195 = arith.constant 0 : index
    %c0_196 = arith.constant 0 : index
    %265 = vector.load %arg11[%c14_194, %c0_195, %c0_196] : memref<16x64x128xbf16, #tpu.memory_space<vmem>>, vector<1x64x128xbf16>
    %266 = vector.shape_cast %265 : vector<1x64x128xbf16> to vector<64x128xbf16>
    %cst_197 = arith.constant dense<0.000000e+00> : vector<1x128xf32>
    %267 = tpu.matmul %264, %266, %cst_197 {dimension_numbers = #tpu.dot_dimension_numbers<[1], [0], [0], [1], [0, 0, 1, 1], [], []>} : vector<1x64xbf16>, vector<64x128xbf16>, vector<1x128xf32> -> vector<1x128xf32>
    %268 = arith.addf %263, %267 : vector<1x128xf32>
    %269 = vector.extract_strided_slice %192 {offsets = [15, 0], sizes = [1, 64], strides = [1, 1]} : vector<16x64xbf16> to vector<1x64xbf16>
    %c15_198 = arith.constant 15 : index
    %c0_199 = arith.constant 0 : index
    %c0_200 = arith.constant 0 : index
    %270 = vector.load %arg11[%c15_198, %c0_199, %c0_200] : memref<16x64x128xbf16, #tpu.memory_space<vmem>>, vector<1x64x128xbf16>
    %271 = vector.shape_cast %270 : vector<1x64x128xbf16> to vector<64x128xbf16>
    %cst_201 = arith.constant dense<0.000000e+00> : vector<1x128xf32>
    %272 = tpu.matmul %269, %271, %cst_201 {dimension_numbers = #tpu.dot_dimension_numbers<[1], [0], [0], [1], [0, 0, 1, 1], [], []>} : vector<1x64xbf16>, vector<64x128xbf16>, vector<1x128xf32> -> vector<1x128xf32>
    %273 = arith.addf %268, %272 : vector<1x128xf32>
    %c0_202 = arith.constant 0 : index
    %c0_203 = arith.constant 0 : index
    %274 = vector.load %arg12[%c0_202, %c0_203] : memref<1x128xf32, #tpu.memory_space<vmem>>, vector<1x128xf32>
    %275 = arith.addf %273, %274 : vector<1x128xf32>
    %cst_204 = arith.constant 0.000000e+00 : f32
    %276 = vector.broadcast %cst_204 : f32 to vector<1x128xf32>
    %277 = arith.maximumf %275, %276 : vector<1x128xf32>
    %cst_205 = arith.constant dense<0.000000e+00> : vector<128xf32>
    %278 = vector.multi_reduction <add>, %277, %cst_205 [0] : vector<1x128xf32> to vector<128xf32>
    %279 = vector.shape_cast %278 : vector<128xf32> to vector<1x128xf32>
    %cst_206 = arith.constant 1.000000e+00 : f32
    %280 = vector.broadcast %cst_206 : f32 to vector<1x128xf32>
    %281 = arith.mulf %279, %280 : vector<1x128xf32>
    %282 = arith.truncf %281 : vector<1x128xf32> to vector<1x128xbf16>
    %c0_207 = arith.constant 0 : index
    %c0_208 = arith.constant 0 : index
    %283 = vector.load %arg13[%c0_207, %c0_208] : memref<128x6xbf16, #tpu.memory_space<vmem>>, vector<128x6xbf16>
    %cst_209 = arith.constant dense<0.000000e+00> : vector<1x6xf32>
    %284 = tpu.matmul %282, %283, %cst_209 {dimension_numbers = #tpu.dot_dimension_numbers<[1], [0], [0], [1], [0, 0, 1, 1], [], []>} : vector<1x128xbf16>, vector<128x6xbf16>, vector<1x6xf32> -> vector<1x6xf32>
    %c0_210 = arith.constant 0 : index
    %c0_211 = arith.constant 0 : index
    %c0_212 = arith.constant 0 : index
    %285 = vector.load %arg14[%c0_210, %c0_211, %c0_212] : memref<1x1x6xf32, #tpu.memory_space<vmem>>, vector<1x1x6xf32>
    %286 = vector.shape_cast %285 : vector<1x1x6xf32> to vector<1x6xf32>
    %287 = vector.shape_cast %284 : vector<1x6xf32> to vector<1x1x6xf32>
    tpu.vector_store %arg14[%c0_210, %c0_211, %c0_212], %287 {strides = array<i32>} : memref<1x1x6xf32, #tpu.memory_space<vmem>>, vector<1x1x6xf32>,
    %288 = tpu.iota {dimensions = array<i32: 1>} : vector<1x256xi32>
    %289 = arith.sitofp %288 : vector<1x256xi32> to vector<1x256xf32>
    %cst_213 = arith.constant 5.000000e-01 : f32
    %290 = vector.broadcast %cst_213 : f32 to vector<1x256xf32>
    %291 = arith.addf %289, %290 : vector<1x256xf32>
    %cst_214 = arith.constant 6.250000e-02 : f32
    %292 = vector.broadcast %cst_214 : f32 to vector<1x256xf32>
    %293 = arith.mulf %291, %292 : vector<1x256xf32>
    %294 = math.floor %293 : vector<1x256xf32>
    %cst_215 = arith.constant 1.600000e+01 : f32
    %295 = vector.broadcast %cst_215 : f32 to vector<1x256xf32>
    %296 = arith.mulf %294, %295 : vector<1x256xf32>
    %297 = arith.subf %289, %296 : vector<1x256xf32>
    %cst_216 = arith.constant 7.500000e+00 : f32
    %298 = vector.broadcast %cst_216 : f32 to vector<1x256xf32>
    %299 = arith.subf %294, %298 : vector<1x256xf32>
    %cst_217 = arith.constant 7.500000e+00 : f32
    %300 = vector.broadcast %cst_217 : f32 to vector<1x256xf32>
    %301 = arith.subf %297, %300 : vector<1x256xf32>
    %302 = vector.extract_strided_slice %284 {offsets = [0, 0], sizes = [1, 1], strides = [1, 1]} : vector<1x6xf32> to vector<1x1xf32>
    %303 = vector.broadcast %302 : vector<1x1xf32> to vector<1x256xf32>
    %304 = arith.mulf %303, %299 : vector<1x256xf32>
    %305 = vector.extract_strided_slice %284 {offsets = [0, 1], sizes = [1, 1], strides = [1, 1]} : vector<1x6xf32> to vector<1x1xf32>
    %306 = vector.broadcast %305 : vector<1x1xf32> to vector<1x256xf32>
    %307 = arith.mulf %306, %301 : vector<1x256xf32>
    %308 = arith.addf %304, %307 : vector<1x256xf32>
    %309 = vector.extract_strided_slice %284 {offsets = [0, 4], sizes = [1, 1], strides = [1, 1]} : vector<1x6xf32> to vector<1x1xf32>
    %310 = vector.broadcast %309 : vector<1x1xf32> to vector<1x256xf32>
    %311 = arith.addf %308, %310 : vector<1x256xf32>
    %312 = vector.extract_strided_slice %284 {offsets = [0, 2], sizes = [1, 1], strides = [1, 1]} : vector<1x6xf32> to vector<1x1xf32>
    %313 = vector.broadcast %312 : vector<1x1xf32> to vector<1x256xf32>
    %314 = arith.mulf %313, %299 : vector<1x256xf32>
    %315 = vector.extract_strided_slice %284 {offsets = [0, 3], sizes = [1, 1], strides = [1, 1]} : vector<1x6xf32> to vector<1x1xf32>
    %316 = vector.broadcast %315 : vector<1x1xf32> to vector<1x256xf32>
    %317 = arith.mulf %316, %301 : vector<1x256xf32>
    %318 = arith.addf %314, %317 : vector<1x256xf32>
    %319 = vector.extract_strided_slice %284 {offsets = [0, 5], sizes = [1, 1], strides = [1, 1]} : vector<1x6xf32> to vector<1x1xf32>
    %320 = vector.broadcast %319 : vector<1x1xf32> to vector<1x256xf32>
    %321 = arith.addf %318, %320 : vector<1x256xf32>
    %322 = tpu.concatenate %311, %321 in 0 : vector<1x256xf32>, vector<1x256xf32> -> vector<2x256xf32>
    %c0_218 = arith.constant 0 : index
    %c0_219 = arith.constant 0 : index
    %c0_220 = arith.constant 0 : index
    %323 = vector.load %arg15[%c0_218, %c0_219, %c0_220] : memref<1x2x256xf32, #tpu.memory_space<vmem>>, vector<1x2x256xf32>
    %324 = vector.shape_cast %323 : vector<1x2x256xf32> to vector<2x256xf32>
    %325 = vector.shape_cast %322 : vector<2x256xf32> to vector<1x2x256xf32>
    tpu.vector_store %arg15[%c0_218, %c0_219, %c0_220], %325 {strides = array<i32>} : memref<1x2x256xf32, #tpu.memory_space<vmem>>, vector<1x2x256xf32>,
    return
  }
  func.func @transform_0(%arg0: i32) -> (i32, i32, i32) {
    %c0_i32 = arith.constant 0 : i32
    %c0_i32_0 = arith.constant 0 : i32
    %c0_i32_1 = arith.constant 0 : i32
    return %arg0, %c0_i32, %c0_i32_0 : i32, i32, i32
  }
  func.func @transform_1(%arg0: i32) -> (i32, i32) {
    %c0_i32 = arith.constant 0 : i32
    %c0_i32_0 = arith.constant 0 : i32
    %c0_i32_1 = arith.constant 0 : i32
    return %c0_i32, %c0_i32_0 : i32, i32
  }
  func.func @transform_2(%arg0: i32) -> (i32, i32) {
    %c0_i32 = arith.constant 0 : i32
    %c0_i32_0 = arith.constant 0 : i32
    %c0_i32_1 = arith.constant 0 : i32
    return %c0_i32, %c0_i32_0 : i32, i32
  }
  func.func @transform_3(%arg0: i32) -> (i32, i32) {
    %c0_i32 = arith.constant 0 : i32
    %c0_i32_0 = arith.constant 0 : i32
    %c0_i32_1 = arith.constant 0 : i32
    return %c0_i32, %c0_i32_0 : i32, i32
  }
  func.func @transform_4(%arg0: i32) -> (i32, i32, i32) {
    %c0_i32 = arith.constant 0 : i32
    %c0_i32_0 = arith.constant 0 : i32
    %c0_i32_1 = arith.constant 0 : i32
    %c0_i32_2 = arith.constant 0 : i32
    return %c0_i32, %c0_i32_0, %c0_i32_1 : i32, i32, i32
  }
  func.func @transform_5(%arg0: i32) -> (i32, i32) {
    %c0_i32 = arith.constant 0 : i32
    %c0_i32_0 = arith.constant 0 : i32
    %c0_i32_1 = arith.constant 0 : i32
    return %c0_i32, %c0_i32_0 : i32, i32
  }
  func.func @transform_6(%arg0: i32) -> (i32, i32) {
    %c0_i32 = arith.constant 0 : i32
    %c0_i32_0 = arith.constant 0 : i32
    %c0_i32_1 = arith.constant 0 : i32
    return %c0_i32, %c0_i32_0 : i32, i32
  }
  func.func @transform_7(%arg0: i32) -> (i32, i32, i32) {
    %c0_i32 = arith.constant 0 : i32
    %c0_i32_0 = arith.constant 0 : i32
    %c0_i32_1 = arith.constant 0 : i32
    %c0_i32_2 = arith.constant 0 : i32
    return %c0_i32, %c0_i32_0, %c0_i32_1 : i32, i32, i32
  }
  func.func @transform_8(%arg0: i32) -> (i32, i32) {
    %c0_i32 = arith.constant 0 : i32
    %c0_i32_0 = arith.constant 0 : i32
    %c0_i32_1 = arith.constant 0 : i32
    return %c0_i32, %c0_i32_0 : i32, i32
  }
  func.func @transform_9(%arg0: i32) -> (i32, i32) {
    %c0_i32 = arith.constant 0 : i32
    %c0_i32_0 = arith.constant 0 : i32
    %c0_i32_1 = arith.constant 0 : i32
    return %c0_i32, %c0_i32_0 : i32, i32
  }
  func.func @transform_10(%arg0: i32) -> (i32, i32, i32) {
    %c0_i32 = arith.constant 0 : i32
    %c0_i32_0 = arith.constant 0 : i32
    %c0_i32_1 = arith.constant 0 : i32
    %c0_i32_2 = arith.constant 0 : i32
    return %c0_i32, %c0_i32_0, %c0_i32_1 : i32, i32, i32
  }
  func.func @transform_11(%arg0: i32) -> (i32, i32) {
    %c0_i32 = arith.constant 0 : i32
    %c0_i32_0 = arith.constant 0 : i32
    %c0_i32_1 = arith.constant 0 : i32
    return %c0_i32, %c0_i32_0 : i32, i32
  }
  func.func @transform_12(%arg0: i32) -> (i32, i32) {
    %c0_i32 = arith.constant 0 : i32
    %c0_i32_0 = arith.constant 0 : i32
    %c0_i32_1 = arith.constant 0 : i32
    return %c0_i32, %c0_i32_0 : i32, i32
  }
  func.func @transform_13(%arg0: i32) -> (i32, i32, i32) {
    %c0_i32 = arith.constant 0 : i32
    %c0_i32_0 = arith.constant 0 : i32
    %c0_i32_1 = arith.constant 0 : i32
    return %arg0, %c0_i32, %c0_i32_0 : i32, i32, i32
  }
  func.func @transform_14(%arg0: i32) -> (i32, i32, i32) {
    %c0_i32 = arith.constant 0 : i32
    %c0_i32_0 = arith.constant 0 : i32
    %c0_i32_1 = arith.constant 0 : i32
    return %arg0, %c0_i32, %c0_i32_0 : i32, i32, i32
  }
}

</mosaic_0001>

<bundles_post_ra>
// kernel: affine_steam_forward.1
= control target key start
LH: loop header
LB: loop body
LE: loop exit
PB: predicated region body
PF: predicated region fallthrough
CT: control target
= control target key end

     0   :  { %s5031_s29 = smov 0   ;;  %s5740_s0 = inlined_call_operand.vmem [shape: bf16[2,64,64], index: 0, kind: input, shape index: {}]   ;;  %s5741_s1 = inlined_call_operand.vmem [shape: bf16[64,32], index: 1, kind: input, shape index: {}]   ;;  %s5742_s2 = inlined_call_operand.vmem [shape: f32[1,32], index: 2, kind: input, shape index: {}]   ;;  %s5743_s3 = inlined_call_operand.vmem [shape: bf16[256,64], index: 3, kind: input, shape index: {}]   ;;  %s5744_s4 = inlined_call_operand.vmem [shape: bf16[16,32,64], index: 4, kind: input, shape index: {}]   ;;  %s5745_s5 = inlined_call_operand.vmem [shape: f32[1,64], index: 5, kind: input, shape index: {}]   ;;  %s5746_s6 = inlined_call_operand.vmem [shape: bf16[64,16], index: 6, kind: input, shape index: {}]   ;;  %s5747_s7 = inlined_call_operand.vmem [shape: bf16[16,64,64], index: 7, kind: input, shape index: {}]   ;;  %s5748_s8 = inlined_call_operand.vmem [shape: f32[1,64], index: 8, kind: input, shape index: {}]   ;;  %s5749_s9 = inlined_call_operand.vmem [shape: bf16[16,4], index: 9, kind: input, shape index: {}]   ;;  %s5750_s10 = inlined_call_operand.vmem [shape: bf16[16,64,128], index: 10, kind: input, shape index: {}]   ;;  %s5751_s11 = inlined_call_operand.vmem [shape: f32[1,128], index: 11, kind: input, shape index: {}]   ;;  %s5752_s12 = inlined_call_operand.vmem [shape: bf16[128,6], index: 12, kind: input, shape index: {}]   ;;  %s5753_s13 = inlined_call_operand.vmem [shape: f32[2,1,6], index: 13, kind: output, shape index: {0}]   ;;  %s5754_s14 = inlined_call_operand.vmem [shape: f32[2,2,256], index: 14, kind: output, shape index: {1}]  }
   0x1 LB: > { %s3543_s30 = sadd.s32 4294967295, %s4948_s29   ;;  %p3547_p0 = scmp.ge.s32.totalorder %s4948_s29, 1  ;;  %s4948_s29 = sphi %s5031_s29, %s25_s29  }
   0x2   : > { %p415_p1 = scmp.lt.s32.totalorder %s4948_s29, 3 }
   0x4   : > { %p416_p2 = pnand %p3547_p0, %p415_p1 }
   0x5   : > { %p464_p3 = scmp.lt.s32.totalorder (!%p416_p2), %s3543_s30, 1 }
   0x6   : > { %419 = sbr.rel (%p416_p2) target bundleno = 1747 (0x6d3), region = 72 }
   0xb   : > { %v4728_v0 = vld [vmem:[%s5741_s1 + $0x18] sm:$0xff]  ;;  %v4727_v1 = vld [vmem:[%s5741_s1 + $0x10] sm:$0xff]  ;;  %s5756_s30 = smov (!%p464_p3, %s3543_s30), 1  ;;  %v4726_v2 = vld [vmem:[%s5741_s1 + $0x8] sm:$0xff]  ;;  %vm542_vm0 = vcmask 523264   ;;  %vm903_vm1 = vcmask 261120  }
   0xc   : > { %559 = vmatpush.bf16.msra.mxu0 %v4728_v0  ;;  %s4719_s21 = sshll.u32 %s5756_s30, 5  ;;  %v4725_v3 = vld [vmem:[%s5741_s1] sm:$0xff]  ;;  %v4730_v38 = vld [vmem:[%s5743_s3 + $0x8] sm:$0xff]  ;;  %v4731_v39 = vld [vmem:[%s5743_s3 + $0x10] sm:$0xff]  ;;  %vm1566_vm2 = vcmask 130048   ;;  %vm2463_vm3 = vcmask 1041408   ;;  %s471_s23 = scalar_lea.vmem %s5753_s13, %s5756_s30 }
   0xd   : > { %s468_s26 = scalar_lea.vmem %s5740_s0, %s4719_s21  ;;  %v4939_v15 = vld [vmem:[%s5742_s2] ss:$0 sm:$0xff]  ;;  %v4732_v40 = vld [vmem:[%s5743_s3 + $0x18] sm:$0xff]  ;;  %v4734_v42 = vld [vmem:[%s5743_s3 + $0x28] sm:$0xff]  ;;  %vm2459_vm4 = vcmask 31744   ;;  %vm3386_vm5 = vcmask 40960  }
   0xe   : > { %v4721_v4 = vld [vmem:[%s468_s26] sm:$0xff]  ;;  %v4722_v5 = vld [vmem:[%s468_s26 + $0x8] sm:$0xff]  ;;  %v4723_v6 = vld [vmem:[%s468_s26 + $0x10] sm:$0xff]  ;;  %vm3454_vm6 = vcmask 1040384   ;;  %s4720_s24 = sshll.u32 %s5756_s30, 2 }
   0xf   : > { %v4724_v7 = vld [vmem:[%s468_s26 + $0x18] sm:$0xff]  ;;  %v4729_v37 = vld [vmem:[%s5743_s3] sm:$0xff]  ;;  %v4735_v43 = vld [vmem:[%s5743_s3 + $0x30] sm:$0xff]  ;;  %s476_s27 = scalar_lea.vmem %s5754_s14, %s4720_s24 }
  0x10   : > { %560 = vmatpush.bf16.msra.mxu0 %v4727_v1  ;;  %v4733_v41 = vld [vmem:[%s5743_s3 + $0x20] sm:$0xff]  ;;  %v4746_v44 = vld [vmem:[%s5744_s4 + $0x8] sm:$0xff]  ;;  %v4736_v46 = vld [vmem:[%s5743_s3 + $0x38] sm:$0xff] }
  0x11   : > { %v4745_v45 = vld [vmem:[%s5744_s4] sm:$0xff]  ;;  %v4748_v47 = vld [vmem:[%s5744_s4 + $0x18] sm:$0xff]  ;;  %v4747_v48 = vld [vmem:[%s5744_s4 + $0x10] sm:$0xff] }
  0x12   : > { %913 = vmatpush.bf16.msra.mxu2 %v4748_v47  ;;  %v4737_v49 = vld [vmem:[%s5743_s3 + $0x40] sm:$0xff]  ;;  %v4750_v51 = vld [vmem:[%s5744_s4 + $0x28] sm:$0xff]  ;;  %v4752_v61 = vld [vmem:[%s5744_s4 + $0x38] sm:$0xff] }
  0x13   : > { %v4749_v55 = vld [vmem:[%s5744_s4 + $0x20] sm:$0xff]  ;;  %v4738_v59 = vld [vmem:[%s5743_s3 + $0x48] sm:$0xff]  ;;  %1027 = vmatpush.bf16.msra.mxu3 %v4752_v61  ;;  %v4751_v1 = vld [vmem:[%s5744_s4 + $0x30] sm:$0xff] }
  0x14   : > { %561 = vmatpush.bf16.msra.mxu0 %v4726_v2  ;;  %v4762_v47 = vld [vmem:[%s5744_s4 + $0x88] sm:$0xff]  ;;  %v4763_v61 = vld [vmem:[%s5744_s4 + $0x90] sm:$0xff] }
  0x16   : > { %914 = vmatpush.bf16.msra.mxu2 %v4747_v48 }
  0x17   : > { %1028 = vmatpush.bf16.msra.mxu3 %v4751_v1 }
  0x18   : > { %562 = vmatpush.bf16.msra.mxu0 %v4725_v3 }
  0x1a   : > { %986 = vmatpush.bf16.msrb.mxu2 %v4750_v51  ;;  %v4761_v51 = vld [vmem:[%s5744_s4 + $0x80] sm:$0xff] }
  0x1b   : > { %3584 = vmatmul.msk.bf16.vlgmr.msra.gmra.mxu0 %vm542_vm0, %v4721_v4 }
  0x1c   : > { %947 = vmatpush.bf16.msrb.mxu0 %v4746_v44 }
  0x1e   : > { %987 = vmatpush.bf16.msrb.mxu2 %v4749_v55  ;;  %v4744_v55 = vld [vmem:[%s5743_s3 + $0x78] sm:$0xff] }
  0x20   : > { %948 = vmatpush.bf16.msrb.mxu0 %v4745_v45  ;;  %v4743_v45 = vld [vmem:[%s5743_s3 + $0x70] sm:$0xff] }
  0x2b   : > { %3585 = vmatmul.msk.bf16.gmra.mxu0 %vm542_vm0, %v4722_v5  ;;  %v4739_v5 = vld [vmem:[%s5743_s3 + $0x50] sm:$0xff] }
  0x3b   : > { %3586 = vmatmul.msk.bf16.gmra.mxu0 %vm542_vm0, %v4723_v6 }
  0x4b   : > { %3587 = vmatmul.msk.bf16.gmra.mxu0 %vm542_vm0, %v4724_v7  ;;  %v4754_v7 = vld [vmem:[%s5744_s4 + $0x48] sm:$0xff] }
  0x98   : > { %v564_v8 = vpop.f32.mrf.mxu0 }
  0x99   : > { %v565_v31 = vadd.f32 %v4939_v15, %v564_v8 }
  0x9b   : > { %v584_v35 = vmax.f32 %v565_v31, 0.0  ;;  %v4757_v31 = vld [vmem:[%s5744_s4 + $0x60] sm:$0xff] }
  0xa0   : > { %v566_v9 = vpop.f32.mrf.mxu0 }
  0xa1   : > { %v567_v28 = vadd.f32 %v4939_v15, %v566_v9 }
  0xa3   : > { %v585_v33 = vmax.f32 %v567_v28, 0.0 }
  0xa5   : > { %v624_v36 = vpack.c.bf16 %v585_v33, %v584_v35  ;;  %v4742_v35 = vld [vmem:[%s5743_s3 + $0x68] sm:$0xff] }
  0xa8   : > { %v569_v10 = vpop.f32.mrf.mxu0 }
  0xa9   : > { %v570_v26 = vadd.f32 %v4939_v15, %v569_v10 }
  0xab   : > { %v586_v32 = vmax.f32 %v570_v26, 0.0 }
  0xb0   : > { %v571_v11 = vpop.f32.mrf.mxu0 }
  0xb1   : > { %v572_v23 = vadd.f32 %v4939_v15, %v571_v11  ;;  %v4753_v11 = vld [vmem:[%s5744_s4 + $0x40] sm:$0xff] }
  0xb3   : > { %v587_v29 = vmax.f32 %v572_v23, 0.0 }
  0xb5   : > { %v625_v34 = vpack.c.bf16 %v587_v29, %v586_v32 }
  0xb8   : > { %v574_v12 = vpop.f32.mrf.mxu0 }
  0xb9   : > { %v575_v20 = vadd.f32 %v4939_v15, %v574_v12 }
  0xbb   : > { %v588_v27 = vmax.f32 %v575_v20, 0.0 }
  0xc0   : > { %v576_v13 = vpop.f32.mrf.mxu0 }
  0xc1   : > { %v577_v18 = vadd.f32 %v4939_v15, %v576_v13 }
  0xc3   : > { %v589_v24 = vmax.f32 %v577_v18, 0.0 }
  0xc5   : > { %v626_v30 = vpack.c.bf16 %v589_v24, %v588_v27  ;;  %v4758_v27 = vld [vmem:[%s5744_s4 + $0x68] sm:$0xff] }
  0xc8   : > { %v579_v14 = vpop.f32.mrf.mxu0 }
  0xc9   : > { %v580_v16 = vadd.f32 %v4939_v15, %v579_v14 }
  0xcb   : > { %v590_v21 = vmax.f32 %v580_v16, 0.0 }
  0xd0   : > { %v581_v17 = vpop.f32.mrf.mxu0 }
  0xd1   : > { %v582_v19 = vadd.f32 %v4939_v15, %v581_v17  ;;  %v4740_v15 = vld [vmem:[%s5743_s3 + $0x58] sm:$0xff] }
  0xd2   : > { %v4756_v17 = vld [vmem:[%s5744_s4 + $0x58] sm:$0xff] }
  0xd3   : > { %v591_v22 = vmax.f32 %v582_v19, 0.0  ;;  %1109 = vmatpush.bf16.msrb.mxu3 %v4756_v17 }
  0xd5   : > { %v627_v25 = vpack.c.bf16 %v591_v22, %v590_v21  ;;  %v4755_v21 = vld [vmem:[%s5744_s4 + $0x50] sm:$0xff] }
  0xd7   : > { %760 = vmatpush.bf16.msra.mxu1 %v627_v25  ;;  %1110 = vmatpush.bf16.msrb.mxu3 %v4755_v21  ;;  %v4741_v25 = vld [vmem:[%s5743_s3 + $0x60] sm:$0xff]  ;;  %v4770_v21 = vld [vmem:[%s5744_s4 + $0xc8] sm:$0xff] }
  0xdb   : > { %761 = vmatpush.bf16.msra.mxu1 %v626_v30 }
  0xdf   : > { %762 = vmatpush.bf16.msra.mxu1 %v625_v34 }
  0xe3   : > { %763 = vmatpush.bf16.msra.mxu1 %v624_v36 }
  0xe6   : > { %3652 = vmatmul.msk.bf16.vlgmr.msra.gmra.mxu1 %vm542_vm0, %v4729_v37  ;;  %v4760_v37 = vld [vmem:[%s5744_s4 + $0x78] sm:$0xff] }
  0xf6   : > { %3653 = vmatmul.msk.bf16.gmra.mxu1 %vm542_vm0, %v4730_v38 }
 0x106   : > { %3654 = vmatmul.msk.bf16.gmra.mxu1 %vm542_vm0, %v4731_v39 }
 0x116   : > { %3655 = vmatmul.msk.bf16.gmra.mxu1 %vm542_vm0, %v4732_v40 }
 0x126   : > { %3656 = vmatmul.msk.bf16.gmra.mxu1 %vm542_vm0, %v4733_v41  ;;  %v4759_v41 = vld [vmem:[%s5744_s4 + $0x70] sm:$0xff] }
 0x136   : > { %3657 = vmatmul.msk.bf16.gmra.mxu1 %vm542_vm0, %v4734_v42 }
 0x146   : > { %3658 = vmatmul.msk.bf16.gmra.mxu1 %vm542_vm0, %v4735_v43 }
 0x156   : > { %3659 = vmatmul.msk.bf16.gmra.mxu1 %vm542_vm0, %v4736_v46 }
 0x163   : > { %v765_v50 = vpop.f32.mrf.mxu1 }
 0x164   : > { %v845_v52 = vpack.c.bf16 %v765_v50, %v765_v50 }
 0x166   : > { %3660 = vmatmul.msk.bf16.gmra.mxu1 %vm542_vm0, %v4737_v49  ;;  %v923_v56 = vunpack.c.l.b16 %v845_v52 }
 0x16b   : > { %v767_v53 = vpop.f32.mrf.mxu1 }
 0x16c   : > { %v846_v54 = vpack.c.bf16 %v767_v53, %v767_v53 }
 0x16e   : > { %v924_v57 = vunpack.c.l.b16 %v846_v54 }
 0x170   : > { %v925_v58 = vpack.c.b16 %v924_v57, %v923_v56  ;;  %v4764_v57 = vld [vmem:[%s5744_s4 + $0x98] sm:$0xff] }
 0x172   : > { %3689 = vmatmul.msk.bf16.vlgmr.msrb.gmra.mxu0 %vm903_vm1, %v925_v58 }
 0x173   : > { %v770_v60 = vpop.f32.mrf.mxu1 }
 0x174   : > { %v847_v62 = vpack.c.bf16 %v770_v60, %v770_v60 }
 0x176   : > { %3661 = vmatmul.msk.bf16.gmra.mxu1 %vm542_vm0, %v4738_v59  ;;  %v888_v2 = vunpack.c.l.b16 %v847_v62 }
 0x17b   : > { %v772_v63 = vpop.f32.mrf.mxu1 }
 0x17c   : > { %v848_v0 = vpack.c.bf16 %v772_v63, %v772_v63 }
 0x17e   : > { %v889_v3 = vunpack.c.l.b16 %v848_v0 }
 0x180   : > { %v890_v4 = vpack.c.b16 %v889_v3, %v888_v2  ;;  %v4766_v2 = vld [vmem:[%s5744_s4 + $0xa8] sm:$0xff] }
 0x181   : > { %1314 = vmatpush.bf16.msra.mxu0 %v4766_v2 }
 0x182   : > { %3680 = vmatmul.msk.bf16.vlgmr.msra.gmra.mxu2 %vm903_vm1, %v890_v4 }
 0x183   : > { %v775_v6 = vpop.f32.mrf.mxu1  ;;  %1068 = vmatpush.bf16.msra.mxu2 %v4754_v7 }
 0x184   : > { %v849_v8 = vpack.c.bf16 %v775_v6, %v775_v6  ;;  %v4765_v6 = vld [vmem:[%s5744_s4 + $0xa0] sm:$0xff] }
 0x185   : > { %1315 = vmatpush.bf16.msra.mxu0 %v4765_v6 }
 0x186   : > { %3662 = vmatmul.msk.bf16.gmra.mxu1 %vm542_vm0, %v4739_v5  ;;  %v962_v12 = vunpack.c.l.b16 %v849_v8 }
 0x187   : > { %1069 = vmatpush.bf16.msra.mxu2 %v4753_v11  ;;  %v4768_v11 = vld [vmem:[%s5744_s4 + $0xb8] sm:$0xff] }
 0x18b   : > { %v777_v9 = vpop.f32.mrf.mxu1 }
 0x18c   : > { %v850_v10 = vpack.c.bf16 %v777_v9, %v777_v9 }
 0x18e   : > { %v963_v13 = vunpack.c.l.b16 %v850_v10 }
 0x190   : > { %v964_v14 = vpack.c.b16 %v963_v13, %v962_v12 }
 0x192   : > { %3702 = vmatmul.msk.bf16.vlgmr.msrb.gmra.mxu2 %vm903_vm1, %v964_v14 }
 0x193   : > { %v780_v16 = vpop.f32.mrf.mxu1  ;;  %1150 = vmatpush.bf16.msrb.mxu2 %v4758_v27 }
 0x194   : > { %v851_v18 = vpack.c.bf16 %v780_v16, %v780_v16 }
 0x196   : > { %3663 = vmatmul.msk.bf16.gmra.mxu1 %vm542_vm0, %v4740_v15  ;;  %v1003_v22 = vunpack.c.l.b16 %v851_v18  ;;  %v4767_v15 = vld [vmem:[%s5744_s4 + $0xb0] sm:$0xff] }
 0x197   : > { %1151 = vmatpush.bf16.msrb.mxu2 %v4757_v31 }
 0x19b   : > { %v782_v19 = vpop.f32.mrf.mxu1 }
 0x19c   : > { %v852_v20 = vpack.c.bf16 %v782_v19, %v782_v19 }
 0x19e   : > { %v1004_v23 = vunpack.c.l.b16 %v852_v20 }
 0x1a0   : > { %v1005_v24 = vpack.c.b16 %v1004_v23, %v1003_v22 }
 0x1a2   : > { %3715 = vmatmul.msk.bf16.vlgmr.msra.gmra.mxu3 %vm903_vm1, %v1005_v24 }
 0x1a3   : > { %v785_v26 = vpop.f32.mrf.mxu1  ;;  %1191 = vmatpush.bf16.msra.mxu3 %v4760_v37 }
 0x1a4   : > { %v853_v28 = vpack.c.bf16 %v785_v26, %v785_v26  ;;  %v4769_v26 = vld [vmem:[%s5744_s4 + $0xc0] sm:$0xff] }
 0x1a6   : > { %3664 = vmatmul.msk.bf16.gmra.mxu1 %vm542_vm0, %v4741_v25  ;;  %v1044_v32 = vunpack.c.l.b16 %v853_v28 }
 0x1a7   : > { %1192 = vmatpush.bf16.msra.mxu3 %v4759_v41 }
 0x1ab   : > { %v787_v29 = vpop.f32.mrf.mxu1 }
 0x1ac   : > { %v854_v30 = vpack.c.bf16 %v787_v29, %v787_v29 }
 0x1ae   : > { %v1045_v33 = vunpack.c.l.b16 %v854_v30 }
 0x1b0   : > { %v1046_v34 = vpack.c.b16 %v1045_v33, %v1044_v32 }
 0x1b2   : > { %3728 = vmatmul.msk.bf16.vlgmr.msra.gmra.mxu2 %vm903_vm1, %v1046_v34 }
 0x1b3   : > { %v790_v36 = vpop.f32.mrf.mxu1  ;;  %1232 = vmatpush.bf16.msra.mxu2 %v4762_v47 }
 0x1b4   : > { %v855_v38 = vpack.c.bf16 %v790_v36, %v790_v36 }
 0x1b6   : > { %3665 = vmatmul.msk.bf16.gmra.mxu1 %vm542_vm0, %v4742_v35  ;;  %v1085_v42 = vunpack.c.l.b16 %v855_v38  ;;  %v4772_v35 = vld [vmem:[%s5744_s4 + $0xd8] sm:$0xff] }
 0x1b7   : > { %1233 = vmatpush.bf16.msra.mxu2 %v4761_v51  ;;  %1437 = vmatpush.bf16.msrb.mxu0 %v4772_v35 }
 0x1bb   : > { %v792_v39 = vpop.f32.mrf.mxu1 }
 0x1bc   : > { %v856_v40 = vpack.c.bf16 %v792_v39, %v792_v39  ;;  %v4771_v39 = vld [vmem:[%s5744_s4 + $0xd0] sm:$0xff] }
 0x1bd   : > { %1438 = vmatpush.bf16.msrb.mxu0 %v4771_v39 }
 0x1be   : > { %v1086_v43 = vunpack.c.l.b16 %v856_v40 }
 0x1c0   : > { %v1087_v44 = vpack.c.b16 %v1086_v43, %v1085_v42 }
 0x1c2   : > { %3741 = vmatmul.msk.bf16.vlgmr.msrb.gmra.mxu3 %vm903_vm1, %v1087_v44 }
 0x1c3   : > { %v795_v46 = vpop.f32.mrf.mxu1  ;;  %1273 = vmatpush.bf16.msrb.mxu3 %v4764_v57 }
 0x1c4   : > { %v857_v48 = vpack.c.bf16 %v795_v46, %v795_v46  ;;  %v4774_v46 = vld [vmem:[%s5744_s4 + $0xe8] sm:$0xff] }
 0x1c6   : > { %3666 = vmatmul.msk.bf16.gmra.mxu1 %vm542_vm0, %v4743_v45  ;;  %v1126_v52 = vunpack.c.l.b16 %v857_v48 }
 0x1c7   : > { %1274 = vmatpush.bf16.msrb.mxu3 %v4763_v61 }
 0x1cb   : > { %v797_v49 = vpop.f32.mrf.mxu1 }
 0x1cc   : > { %v858_v50 = vpack.c.bf16 %v797_v49, %v797_v49 }
 0x1ce   : > { %v1127_v53 = vunpack.c.l.b16 %v858_v50  ;;  %v4773_v50 = vld [vmem:[%s5744_s4 + $0xe0] sm:$0xff] }
 0x1d0   : > { %v1128_v54 = vpack.c.b16 %v1127_v53, %v1126_v52 }
 0x1d2   : > { %3754 = vmatmul.msk.bf16.vlgmr.msrb.gmra.mxu2 %vm903_vm1, %v1128_v54 }
 0x1d3   : > { %v800_v56 = vpop.f32.mrf.mxu1  ;;  %1355 = vmatpush.bf16.msrb.mxu2 %v4768_v11 }
 0x1d4   : > { %v859_v58 = vpack.c.bf16 %v800_v56, %v800_v56 }
 0x1d6   : > { %3667 = vmatmul.msk.bf16.gmra.mxu1 %vm542_vm0, %v4744_v55  ;;  %v1167_v62 = vunpack.c.l.b16 %v859_v58  ;;  %v4776_v55 = vld [vmem:[%s5744_s4 + $0xf8] sm:$0xff] }
 0x1d7   : > { %1356 = vmatpush.bf16.msrb.mxu2 %v4767_v15 }
 0x1db   : > { %v802_v59 = vpop.f32.mrf.mxu1 }
 0x1dc   : > { %v860_v60 = vpack.c.bf16 %v802_v59, %v802_v59  ;;  %v4775_v59 = vld [vmem:[%s5744_s4 + $0xf0] sm:$0xff] }
 0x1de   : > { %v1168_v63 = vunpack.c.l.b16 %v860_v60 }
 0x1e0   : > { %v1169_v0 = vpack.c.b16 %v1168_v63, %v1167_v62 }
 0x1e2   : > { %3767 = vmatmul.msk.bf16.vlgmr.msra.gmra.mxu3 %vm903_vm1, %v1169_v0 }
 0x1e3   : > { %v805_v1 = vpop.f32.mrf.mxu1  ;;  %1396 = vmatpush.bf16.msra.mxu3 %v4770_v21 }
 0x1e4   : > { %v861_v3 = vpack.c.bf16 %v805_v1, %v805_v1 }
 0x1e6   : > { %v1208_v7 = vunpack.c.l.b16 %v861_v3 }
 0x1e7   : > { %1397 = vmatpush.bf16.msra.mxu3 %v4769_v26 }
 0x1eb   : > { %v807_v4 = vpop.f32.mrf.mxu1 }
 0x1ec   : > { %v862_v5 = vpack.c.bf16 %v807_v4, %v807_v4 }
 0x1ee   : > { %v1209_v8 = vunpack.c.l.b16 %v862_v5 }
 0x1ef   : > { %v950_v30 = vpop.f32.mrf.mxu0 }
 0x1f0   : > { %v1210_v9 = vpack.c.b16 %v1209_v8, %v1208_v7 }
 0x1f2   : > { %3780 = vmatmul.msk.bf16.vlgmr.msra.gmra.mxu2 %vm903_vm1, %v1210_v9 }
 0x1f3   : > { %v810_v10 = vpop.f32.mrf.mxu1  ;;  %1478 = vmatpush.bf16.msra.mxu2 %v4774_v46 }
 0x1f4   : > { %v863_v12 = vpack.c.bf16 %v810_v10, %v810_v10 }
 0x1f6   : > { %v1249_v16 = vunpack.c.l.b16 %v863_v12 }
 0x1f7   : > { %1479 = vmatpush.bf16.msra.mxu2 %v4773_v50  ;;  %v952_v26 = vpop.f32.mrf.mxu0 }
 0x1fb   : > { %v812_v13 = vpop.f32.mrf.mxu1 }
 0x1fc   : > { %v864_v14 = vpack.c.bf16 %v812_v13, %v812_v13 }
 0x1fe   : > { %v1250_v17 = vunpack.c.l.b16 %v864_v14 }
 0x200   : > { %v1251_v18 = vpack.c.b16 %v1250_v17, %v1249_v16 }
 0x202   : > { %3793 = vmatmul.msk.bf16.vlgmr.msrb.gmra.mxu3 %vm903_vm1, %v1251_v18 }
 0x203   : > { %v815_v19 = vpop.f32.mrf.mxu1  ;;  %1519 = vmatpush.bf16.msrb.mxu3 %v4776_v55 }
 0x204   : > { %v865_v22 = vpack.c.bf16 %v815_v19, %v815_v19 }
 0x205   : > { %v916_v20 = vpop.f32.mrf.mxu2 }
 0x206   : > { %v1290_v27 = vunpack.c.l.b16 %v865_v22  ;;  %v951_v32 = vadd.f32 %v950_v30, %v916_v20 }
 0x207   : > { %1520 = vmatpush.bf16.msrb.mxu3 %v4775_v59 }
 0x20b   : > { %v817_v23 = vpop.f32.mrf.mxu1 }
 0x20c   : > { %v866_v24 = vpack.c.bf16 %v817_v23, %v817_v23 }
 0x20d   : > { %v5213_v25 = vpop.f32.mrf.mxu2 }
 0x20e   : > { %v1291_v28 = vunpack.c.l.b16 %v866_v24 }
 0x210   : > { %v1292_v29 = vpack.c.b16 %v1291_v28, %v1290_v27 }
 0x212   : > { %3806 = vmatmul.msk.bf16.vlgmr.msra.gmra.mxu0 %vm903_vm1, %v1292_v29 }
 0x213   : > { %v820_v31 = vpop.f32.mrf.mxu1 }
 0x214   : > { %v867_v36 = vpack.c.bf16 %v820_v31, %v820_v31  ;;  %v953_v31 = vadd.f32 %v952_v26, %v5213_v25  ;;  %v4791_v26 = vld [vmem:[%s5747_s7 + $0x50] sm:$0xff] }
 0x215   : > { %v989_v33 = vpop.f32.mrf.mxu2 }
 0x216   : > { %v994_v34 = vadd.f32 %v989_v33, %v951_v32  ;;  %v1331_v40 = vunpack.c.l.b16 %v867_v36 }
 0x21b   : > { %v822_v37 = vpop.f32.mrf.mxu1 }
 0x21c   : > { %v868_v38 = vpack.c.bf16 %v822_v37, %v822_v37 }
 0x21d   : > { %v991_v13 = vpop.f32.mrf.mxu2 }
 0x21e   : > { %v1332_v41 = vunpack.c.l.b16 %v868_v38  ;;  %v995_v33 = vadd.f32 %v991_v13, %v953_v31  ;;  %v4783_v13 = vld [vmem:[%s5747_s7 + $0x10] sm:$0xff] }
 0x220   : > { %v1333_v42 = vpack.c.b16 %v1332_v41, %v1331_v40 }
 0x222   : > { %3819 = vmatmul.msk.bf16.vlgmr.msrb.gmra.mxu2 %vm903_vm1, %v1333_v42 }
 0x223   : > { %v825_v43 = vpop.f32.mrf.mxu1 }
 0x224   : > { %v869_v47 = vpack.c.bf16 %v825_v43, %v825_v43 }
 0x225   : > { %v1030_v44 = vpop.f32.mrf.mxu3 }
 0x226   : > { %v1035_v45 = vadd.f32 %v1030_v44, %v994_v34  ;;  %v1372_v51 = vunpack.c.l.b16 %v869_v47 }
 0x22b   : > { %v827_v48 = vpop.f32.mrf.mxu1 }
 0x22c   : > { %v870_v49 = vpack.c.bf16 %v827_v48, %v827_v48 }
 0x22d   : > { %v1032_v14 = vpop.f32.mrf.mxu3 }
 0x22e   : > { %v1373_v52 = vunpack.c.l.b16 %v870_v49  ;;  %v1036_v36 = vadd.f32 %v1032_v14, %v995_v33  ;;  %v4787_v14 = vld [vmem:[%s5747_s7 + $0x30] sm:$0xff] }
 0x230   : > { %v1374_v53 = vpack.c.b16 %v1373_v52, %v1372_v51 }
 0x232   : > { %3832 = vmatmul.msk.bf16.vlgmr.msra.gmra.mxu3 %vm903_vm1, %v1374_v53 }
 0x233   : > { %v830_v54 = vpop.f32.mrf.mxu1 }
 0x234   : > { %v871_v56 = vpack.c.bf16 %v830_v54, %v830_v54 }
 0x235   : > { %v1071_v15 = vpop.f32.mrf.mxu2 }
 0x236   : > { %v1413_v60 = vunpack.c.l.b16 %v871_v56  ;;  %v1076_v34 = vadd.f32 %v1071_v15, %v1035_v45  ;;  %v4782_v15 = vld [vmem:[%s5747_s7 + $0x8] sm:$0xff] }
 0x23b   : > { %v832_v57 = vpop.f32.mrf.mxu1 }
 0x23c   : > { %v872_v58 = vpack.c.bf16 %v832_v57, %v832_v57 }
 0x23d   : > { %v1073_v17 = vpop.f32.mrf.mxu2 }
 0x23e   : > { %v1414_v61 = vunpack.c.l.b16 %v872_v58  ;;  %v1077_v39 = vadd.f32 %v1073_v17, %v1036_v36  ;;  %v4780_v17 = vld [vmem:[%s5746_s6 + $0x18] sm:$0xff]  ;;  %v4803_v36 = vld [vmem:[%s5747_s7 + $0xb0] sm:$0xff] }
 0x240   : > { %v1415_v62 = vpack.c.b16 %v1414_v61, %v1413_v60 }
 0x242   : > { %3845 = vmatmul.msk.bf16.vlgmr.msrb.gmra.mxu0 %vm903_vm1, %v1415_v62 }
 0x243   : > { %v835_v63 = vpop.f32.mrf.mxu1 }
 0x244   : > { %v873_v0 = vpack.c.bf16 %v835_v63, %v835_v63 }
 0x245   : > { %v1112_v16 = vpop.f32.mrf.mxu3 }
 0x246   : > { %v1454_v3 = vunpack.c.l.b16 %v873_v0  ;;  %v1117_v37 = vadd.f32 %v1112_v16, %v1076_v34  ;;  %v4940_v0 = vld [vmem:[%s5745_s5] ss:$0 sm:$0xff]  ;;  %v4779_v16 = vld [vmem:[%s5746_s6 + $0x10] sm:$0xff] }
 0x24b   : > { %v837_v1 = vpop.f32.mrf.mxu1 }
 0x24c   : > { %v874_v2 = vpack.c.bf16 %v837_v1, %v837_v1 }
 0x24d   : > { %v1114_v18 = vpop.f32.mrf.mxu3 }
 0x24e   : > { %v1455_v4 = vunpack.c.l.b16 %v874_v2  ;;  %v1118_v41 = vadd.f32 %v1114_v18, %v1077_v39  ;;  %v4781_v18 = vld [vmem:[%s5747_s7] sm:$0xff] }
 0x250   : > { %v1456_v5 = vpack.c.b16 %v1455_v4, %v1454_v3 }
 0x252   : > { %3858 = vmatmul.msk.bf16.vlgmr.msra.gmra.mxu2 %vm903_vm1, %v1456_v5 }
 0x253   : > { %v840_v6 = vpop.f32.mrf.mxu1 }
 0x254   : > { %v875_v7 = vpack.c.bf16 %v840_v6, %v840_v6 }
 0x255   : > { %v1153_v19 = vpop.f32.mrf.mxu2 }
 0x256   : > { %v1495_v10 = vunpack.c.l.b16 %v875_v7  ;;  %v1158_v40 = vadd.f32 %v1153_v19, %v1117_v37  ;;  %v4786_v19 = vld [vmem:[%s5747_s7 + $0x28] sm:$0xff] }
 0x25b   : > { %v842_v8 = vpop.f32.mrf.mxu1 }
 0x25c   : > { %v876_v9 = vpack.c.bf16 %v842_v8, %v842_v8 }
 0x25d   : > { %v1155_v21 = vpop.f32.mrf.mxu2 }
 0x25e   : > { %v1496_v11 = vunpack.c.l.b16 %v876_v9  ;;  %v1159_v43 = vadd.f32 %v1155_v21, %v1118_v41  ;;  %v4777_v9 = vld [vmem:[%s5746_s6] sm:$0xff]  ;;  %v4802_v41 = vld [vmem:[%s5747_s7 + $0xa8] sm:$0xff] }
 0x25f   : > { %v4785_v21 = vld [vmem:[%s5747_s7 + $0x20] sm:$0xff] }
 0x260   : > { %v1497_v12 = vpack.c.b16 %v1496_v11, %v1495_v10  ;;  %v4778_v10 = vld [vmem:[%s5746_s6 + $0x8] sm:$0xff]  ;;  %v4784_v11 = vld [vmem:[%s5747_s7 + $0x18] sm:$0xff] }
 0x261   : > { %1708 = vmatpush.bf16.msra.mxu3 %v4784_v11 }
 0x262   : > { %3871 = vmatmul.msk.bf16.vlgmr.msrb.gmra.mxu3 %vm903_vm1, %v1497_v12  ;;  %v4788_v12 = vld [vmem:[%s5747_s7 + $0x38] sm:$0xff] }
 0x263   : > { %1668 = vmatpush.bf16.msrb.mxu2 %v4788_v12  ;;  %v4820_v12 = vld [vmem:[%s5747_s7 + $0x138] sm:$0xff] }
 0x265   : > { %v1194_v20 = vpop.f32.mrf.mxu3  ;;  %1709 = vmatpush.bf16.msra.mxu3 %v4783_v13 }
 0x266   : > { %v1199_v42 = vadd.f32 %v1194_v20, %v1158_v40  ;;  %v4796_v20 = vld [vmem:[%s5747_s7 + $0x78] sm:$0xff] }
 0x267   : > { %1669 = vmatpush.bf16.msrb.mxu2 %v4787_v14  ;;  %v4822_v14 = vld [vmem:[%s5747_s7 + $0x148] sm:$0xff] }
 0x269   : > { %1710 = vmatpush.bf16.msra.mxu3 %v4782_v15  ;;  %v4838_v15 = vld [vmem:[%s5747_s7 + $0x1c8] sm:$0xff] }
 0x26b   : > { %1670 = vmatpush.bf16.msrb.mxu2 %v4786_v19 }
 0x26d   : > { %v1196_v22 = vpop.f32.mrf.mxu3  ;;  %1711 = vmatpush.bf16.msra.mxu3 %v4781_v18  ;;  %v4819_v18 = vld [vmem:[%s5747_s7 + $0x130] sm:$0xff] }
 0x26e   : > { %v1200_v48 = vadd.f32 %v1196_v22, %v1159_v43  ;;  %v4795_v22 = vld [vmem:[%s5747_s7 + $0x70] sm:$0xff] }
 0x26f   : > { %1671 = vmatpush.bf16.msrb.mxu2 %v4785_v21  ;;  %v4837_v21 = vld [vmem:[%s5747_s7 + $0x1c0] sm:$0xff] }
 0x271   : > { %1811 = vmatpush.bf16.msrb.mxu3 %v4796_v20  ;;  %v4821_v20 = vld [vmem:[%s5747_s7 + $0x140] sm:$0xff] }
 0x275   : > { %v1235_v23 = vpop.f32.mrf.mxu2  ;;  %1812 = vmatpush.bf16.msrb.mxu3 %v4795_v22 }
 0x276   : > { %v1240_v44 = vadd.f32 %v1235_v23, %v1199_v42  ;;  %v4792_v23 = vld [vmem:[%s5747_s7 + $0x58] sm:$0xff]  ;;  %v4814_v42 = vld [vmem:[%s5747_s7 + $0x108] sm:$0xff] }
 0x277   : > { %1757 = vmatpush.bf16.msra.mxu2 %v4792_v23 }
 0x27b   : > { %1758 = vmatpush.bf16.msra.mxu2 %v4791_v26 }
 0x27d   : > { %v1237_v27 = vpop.f32.mrf.mxu2 }
 0x27e   : > { %v1241_v51 = vadd.f32 %v1237_v27, %v1200_v48  ;;  %v4793_v27 = vld [vmem:[%s5747_s7 + $0x60] sm:$0xff]  ;;  %v4828_v48 = vld [vmem:[%s5747_s7 + $0x178] sm:$0xff] }
 0x285   : > { %v1276_v24 = vpop.f32.mrf.mxu3 }
 0x286   : > { %v1281_v49 = vadd.f32 %v1276_v24, %v1240_v44  ;;  %v4794_v24 = vld [vmem:[%s5747_s7 + $0x68] sm:$0xff]  ;;  %v4799_v44 = vld [vmem:[%s5747_s7 + $0x90] sm:$0xff] }
 0x287   : > { %1813 = vmatpush.bf16.msrb.mxu3 %v4794_v24  ;;  %v4818_v24 = vld [vmem:[%s5747_s7 + $0x128] sm:$0xff] }
 0x28b   : > { %1814 = vmatpush.bf16.msrb.mxu3 %v4793_v27  ;;  %v4836_v27 = vld [vmem:[%s5747_s7 + $0x1b8] sm:$0xff] }
 0x28d   : > { %v1278_v28 = vpop.f32.mrf.mxu3 }
 0x28e   : > { %v1282_v52 = vadd.f32 %v1278_v28, %v1241_v51  ;;  %v4790_v28 = vld [vmem:[%s5747_s7 + $0x48] sm:$0xff] }
 0x28f   : > { %v1317_v29 = vpop.f32.mrf.mxu0  ;;  %1759 = vmatpush.bf16.msra.mxu2 %v4790_v28  ;;  %v4798_v51 = vld [vmem:[%s5747_s7 + $0x88] sm:$0xff] }
 0x290   : > { %v1322_v25 = vadd.f32 %v1317_v29, %v1281_v49  ;;  %v4789_v29 = vld [vmem:[%s5747_s7 + $0x40] sm:$0xff] }
 0x291   : > { %v4801_v49 = vld [vmem:[%s5747_s7 + $0xa0] sm:$0xff] }
 0x293   : > { %1760 = vmatpush.bf16.msra.mxu2 %v4789_v29 }
 0x297   : > { %v1319_v35 = vpop.f32.mrf.mxu0 }
 0x298   : > { %v1323_v45 = vadd.f32 %v1319_v35, %v1282_v52  ;;  %v4815_v35 = vld [vmem:[%s5747_s7 + $0x110] sm:$0xff]  ;;  %v4812_v52 = vld [vmem:[%s5747_s7 + $0xf8] sm:$0xff] }
 0x2a5   : > { %v1358_v30 = vpop.f32.mrf.mxu2 }
 0x2a6   : > { %v1363_v53 = vadd.f32 %v1358_v30, %v1322_v25  ;;  %v4816_v30 = vld [vmem:[%s5747_s7 + $0x118] sm:$0xff] }
 0x2ad   : > { %v1360_v38 = vpop.f32.mrf.mxu2 }
 0x2ae   : > { %v1364_v56 = vadd.f32 %v1360_v38, %v1323_v45  ;;  %v4800_v38 = vld [vmem:[%s5747_s7 + $0x98] sm:$0xff]  ;;  %v4797_v45 = vld [vmem:[%s5747_s7 + $0x80] sm:$0xff] }
 0x2b5   : > { %v1399_v32 = vpop.f32.mrf.mxu3 }
 0x2b6   : > { %v1404_v54 = vadd.f32 %v1399_v32, %v1363_v53  ;;  %v4804_v32 = vld [vmem:[%s5747_s7 + $0xb8] sm:$0xff] }
 0x2bd   : > { %v1401_v46 = vpop.f32.mrf.mxu3 }
 0x2be   : > { %v1405_v59 = vadd.f32 %v1401_v46, %v1364_v56  ;;  %v4813_v46 = vld [vmem:[%s5747_s7 + $0x100] sm:$0xff]  ;;  %v4811_v56 = vld [vmem:[%s5747_s7 + $0xf0] sm:$0xff] }
 0x2bf   : > { %v1440_v47 = vpop.f32.mrf.mxu0 }
 0x2c0   : > { %v1445_v57 = vadd.f32 %v1440_v47, %v1404_v54 }
 0x2c7   : > { %v1442_v58 = vpop.f32.mrf.mxu0 }
 0x2c8   : > { %v1446_v62 = vadd.f32 %v1442_v58, %v1405_v59 }
 0x2d5   : > { %v1481_v50 = vpop.f32.mrf.mxu2 }
 0x2d6   : > { %v1486_v60 = vadd.f32 %v1481_v50, %v1445_v57  ;;  %v4808_v57 = vld [vmem:[%s5747_s7 + $0xd8] sm:$0xff] }
 0x2dd   : > { %v1483_v61 = vpop.f32.mrf.mxu2 }
 0x2de   : > { %v1487_v1 = vadd.f32 %v1483_v61, %v1446_v62  ;;  %v4826_v61 = vld [vmem:[%s5747_s7 + $0x168] sm:$0xff]  ;;  %v4807_v62 = vld [vmem:[%s5747_s7 + $0xd0] sm:$0xff] }
 0x2e5   : > { %v1522_v55 = vpop.f32.mrf.mxu3 }
 0x2e6   : > { %v1527_v63 = vadd.f32 %v1522_v55, %v1486_v60  ;;  %v4827_v55 = vld [vmem:[%s5747_s7 + $0x170] sm:$0xff]  ;;  %v4810_v60 = vld [vmem:[%s5747_s7 + $0xe8] sm:$0xff] }
 0x2e8   : > { %v1533_v3 = vadd.f32 %v4940_v0, %v1527_v63  ;;  %v4825_v63 = vld [vmem:[%s5747_s7 + $0x160] sm:$0xff] }
 0x2ea   : > { %v1535_v6 = vmax.f32 %v1533_v3, 0.0 }
 0x2ed   : > { %v1524_v2 = vpop.f32.mrf.mxu3 }
 0x2ee   : > { %v1528_v4 = vadd.f32 %v1524_v2, %v1487_v1  ;;  %v4809_v1 = vld [vmem:[%s5747_s7 + $0xe0] sm:$0xff]  ;;  %v4806_v2 = vld [vmem:[%s5747_s7 + $0xc8] sm:$0xff] }
 0x2f0   : > { %v1534_v5 = vadd.f32 %v4940_v0, %v1528_v4 }
 0x2f2   : > { %v1536_v7 = vmax.f32 %v1534_v5, 0.0  ;;  %v4824_v5 = vld [vmem:[%s5747_s7 + $0x158] sm:$0xff] }
 0x2f4   : > { %v1545_v8 = vpack.c.bf16 %v1536_v7, %v1535_v6  ;;  %v4840_v6 = vld [vmem:[%s5747_s7 + $0x1d8] sm:$0xff] }
 0x2f6   : > { %1586 = vmatpush.bf16.msra.mxu0 %v1545_v8  ;;  %v4805_v8 = vld [vmem:[%s5747_s7 + $0xc0] sm:$0xff] }
 0x2f9   : > { %3888 = vmatmul.msk.bf16.vlgmr.msra.gmra.mxu0 %vm1566_vm2, %v4777_v9  ;;  %v4823_v9 = vld [vmem:[%s5747_s7 + $0x150] sm:$0xff] }
 0x2fa   : > { %2069 = vmatpush.bf16.msrb.mxu0 %v4816_v30  ;;  %v4817_v30 = vld [vmem:[%s5747_s7 + $0x120] sm:$0xff] }
 0x2fe   : > { %2070 = vmatpush.bf16.msrb.mxu0 %v4815_v35 }
 0x302   : > { %2071 = vmatpush.bf16.msrb.mxu0 %v4814_v42 }
 0x306   : > { %2072 = vmatpush.bf16.msrb.mxu0 %v4813_v46 }
 0x309   : > { %3889 = vmatmul.msk.bf16.gmra.mxu0 %vm1566_vm2, %v4778_v10  ;;  %v4839_v10 = vld [vmem:[%s5747_s7 + $0x1d0] sm:$0xff] }
 0x30a   : > { %2227 = vmatpush.bf16.msra.mxu0 %v4828_v48 }
 0x30e   : > { %2228 = vmatpush.bf16.msra.mxu0 %v4827_v55 }
 0x312   : > { %2229 = vmatpush.bf16.msra.mxu0 %v4826_v61 }
 0x316   : > { %2230 = vmatpush.bf16.msra.mxu0 %v4825_v63  ;;  %v4889_v63 = vld [vmem:[%s5750_s10 + $0x158] sm:$0xff] }
 0x317   : > { %3039 = vmatpush.bf16.msrb.mxu1 %v4889_v63  ;;  %v4860_v63 = vld [vmem:[%s5750_s10 + $0x70] sm:$0xff] }
 0x319   : > { %3890 = vmatmul.msk.bf16.gmra.mxu0 %vm1566_vm2, %v4779_v16 }
 0x329   : > { %3891 = vmatmul.msk.bf16.gmra.mxu0 %vm1566_vm2, %v4780_v17 }
 0x376   : > { %v1588_v31 = vpop.f32.mrf.mxu0 }
 0x377   : > { %v1608_v33 = vpack.c.bf16 %v1588_v31, %v1588_v31  ;;  %v4835_v31 = vld [vmem:[%s5747_s7 + $0x1b0] sm:$0xff] }
 0x379   : > { %v1634_v34 = vunpack.c.l.b16 %v1608_v33  ;;  %3933 = vmatmul.msk.bf16.vlgmr.msra.gmra.mxu3 %vm542_vm0, %v1608_v33  ;;  %v4834_v33 = vld [vmem:[%s5747_s7 + $0x1a8] sm:$0xff] }
 0x37a   : > { %1915 = vmatpush.bf16.msra.mxu3 %v4804_v32  ;;  %v4832_v32 = vld [vmem:[%s5747_s7 + $0x198] sm:$0xff] }
 0x37b   : > { %v1635_v37 = vpack.c.b16 %v1634_v34, %v1634_v34  ;;  %v4831_v34 = vld [vmem:[%s5747_s7 + $0x190] sm:$0xff] }
 0x37d   : > { %v1636_v39 = vrot.slane %v1635_v37, 2 }
 0x37e   : > { %v1590_v40 = vpop.f32.mrf.mxu0  ;;  %1916 = vmatpush.bf16.msra.mxu3 %v4803_v36  ;;  %v4833_v36 = vld [vmem:[%s5747_s7 + $0x1a0] sm:$0xff] }
 0x37f   : > { %v1609_v43 = vpack.c.bf16 %v1590_v40, %v1590_v40  ;;  %3916 = vmatmul.msk.bf16.vlgmr.msrb.gmra.mxu2 %vm542_vm0, %v1636_v39 }
 0x380   : > { %1861 = vmatpush.bf16.msrb.mxu2 %v4800_v38  ;;  %v4830_v38 = vld [vmem:[%s5747_s7 + $0x188] sm:$0xff] }
 0x381   : > { %v1777_v47 = vunpack.c.l.b16 %v1609_v43 }
 0x382   : > { %1917 = vmatpush.bf16.msra.mxu3 %v4802_v41  ;;  %v4829_v41 = vld [vmem:[%s5747_s7 + $0x180] sm:$0xff] }
 0x383   : > { %v1778_v50 = vpack.c.b16 %v1777_v47, %v1777_v47  ;;  %v4843_v47 = vld [vmem:[%s5747_s7 + $0x1f0] sm:$0xff] }
 0x384   : > { %1862 = vmatpush.bf16.msrb.mxu2 %v4799_v44  ;;  %v4844_v44 = vld [vmem:[%s5747_s7 + $0x1f8] sm:$0xff] }
 0x385   : > { %v1779_v53 = vrot.slane %v1778_v50, 2 }
 0x386   : > { %v1593_v25 = vpop.f32.mrf.mxu0  ;;  %1918 = vmatpush.bf16.msra.mxu3 %v4801_v49  ;;  %v4842_v49 = vld [vmem:[%s5747_s7 + $0x1e8] sm:$0xff] }
 0x387   : > { %v1610_v54 = vpack.c.bf16 %v1593_v25, %v1593_v25 }
 0x388   : > { %1863 = vmatpush.bf16.msrb.mxu2 %v4798_v51  ;;  %v4841_v51 = vld [vmem:[%s5747_s7 + $0x1e0] sm:$0xff] }
 0x389   : > { %3983 = vmatmul.msk.bf16.vlgmr.msrb.gmra.mxu3 %vm542_vm0, %v1779_v53  ;;  %v1881_v58 = vunpack.c.l.b16 %v1610_v54 }
 0x38a   : > { %2019 = vmatpush.bf16.msrb.mxu3 %v4812_v52 }
 0x38b   : > { %v1882_v0 = vpack.c.b16 %v1881_v58, %v1881_v58 }
 0x38c   : > { %1864 = vmatpush.bf16.msrb.mxu2 %v4797_v45 }
 0x38d   : > { %v1883_v3 = vrot.slane %v1882_v0, 2 }
 0x38e   : > { %v1595_v59 = vpop.f32.mrf.mxu0  ;;  %2020 = vmatpush.bf16.msrb.mxu3 %v4811_v56 }
 0x38f   : > { %3958 = vmatmul.msk.bf16.vlgmr.msra.gmra.mxu2 %vm542_vm0, %v1609_v43  ;;  %v1611_v11 = vpack.c.bf16 %v1595_v59, %v1595_v59 }
 0x390   : > { %1965 = vmatpush.bf16.msra.mxu2 %v4808_v57 }
 0x391   : > { %v1985_v16 = vunpack.c.l.b16 %v1611_v11 }
 0x392   : > { %2021 = vmatpush.bf16.msrb.mxu3 %v4810_v60 }
 0x393   : > { %v1986_v22 = vpack.c.b16 %v1985_v16, %v1985_v16 }
 0x394   : > { %1966 = vmatpush.bf16.msra.mxu2 %v4807_v62 }
 0x395   : > { %v1987_v28 = vrot.slane %v1986_v22, 2 }
 0x396   : > { %v1598_v4 = vpop.f32.mrf.mxu0  ;;  %2022 = vmatpush.bf16.msrb.mxu3 %v4809_v1 }
 0x397   : > { %v1612_v7 = vpack.c.bf16 %v1598_v4, %v1598_v4 }
 0x398   : > { %1967 = vmatpush.bf16.msra.mxu2 %v4806_v2 }
 0x399   : > { %4033 = vmatmul.msk.bf16.vlgmr.msra.gmra.mxu3 %vm542_vm0, %v1883_v3  ;;  %4108 = vmatmul.msk.bf16.vlgmr.msrb.gmra.mxu0 %vm542_vm0, %v1612_v7  ;;  %v2089_v37 = vunpack.c.l.b16 %v1612_v7 }
 0x39a   : > { %2173 = vmatpush.bf16.msra.mxu3 %v4824_v5  ;;  %2381 = vmatpush.bf16.msrb.mxu0 %v4840_v6 }
 0x39b   : > { %v2090_v40 = vpack.c.b16 %v2089_v37, %v2089_v37 }
 0x39c   : > { %1968 = vmatpush.bf16.msra.mxu2 %v4805_v8 }
 0x39d   : > { %v2091_v43 = vrot.slane %v2090_v40, 2 }
 0x39e   : > { %v1600_v13 = vpop.f32.mrf.mxu0  ;;  %2174 = vmatpush.bf16.msra.mxu3 %v4823_v9  ;;  %2382 = vmatpush.bf16.msrb.mxu0 %v4839_v10 }
 0x39f   : > { %4008 = vmatmul.msk.bf16.vlgmr.msrb.gmra.mxu2 %vm542_vm0, %v1610_v54  ;;  %v1613_v17 = vpack.c.bf16 %v1600_v13, %v1600_v13 }
 0x3a0   : > { %2123 = vmatpush.bf16.msrb.mxu2 %v4820_v12 }
 0x3a1   : > { %v2193_v19 = vunpack.c.l.b16 %v1613_v17 }
 0x3a2   : > { %2175 = vmatpush.bf16.msra.mxu3 %v4822_v14  ;;  %2383 = vmatpush.bf16.msrb.mxu0 %v4838_v15 }
 0x3a3   : > { %v2194_v23 = vpack.c.b16 %v2193_v19, %v2193_v19 }
 0x3a4   : > { %2124 = vmatpush.bf16.msrb.mxu2 %v4819_v18 }
 0x3a5   : > { %v2195_v26 = vrot.slane %v2194_v23, 2 }
 0x3a6   : > { %2176 = vmatpush.bf16.msra.mxu3 %v4821_v20  ;;  %2384 = vmatpush.bf16.msrb.mxu0 %v4837_v21  ;;  %v1603_v29 = vpop.f32.mrf.mxu0 }
 0x3a7   : > { %v1614_v42 = vpack.c.bf16 %v1603_v29, %v1603_v29  ;;  %v4853_v29 = vld [vmem:[%s5750_s10 + $0x38] sm:$0xff] }
 0x3a8   : > { %2125 = vmatpush.bf16.msrb.mxu2 %v4818_v24 }
 0x3a9   : > { %4083 = vmatmul.msk.bf16.vlgmr.msrb.gmra.mxu3 %vm542_vm0, %v1987_v28  ;;  %4183 = vmatmul.msk.bf16.vlgmr.msra.gmra.mxu0 %vm542_vm0, %v2195_v26  ;;  %v2297_v46 = vunpack.c.l.b16 %v1614_v42  ;;  %v4849_v28 = vld [vmem:[%s5750_s10 + $0x18] sm:$0xff] }
 0x3aa   : > { %2331 = vmatpush.bf16.msrb.mxu3 %v4836_v27  ;;  %v4888_v27 = vld [vmem:[%s5750_s10 + $0x150] sm:$0xff]  ;;  %2537 = vmatpush.bf16.msra.mxu0 %v4853_v29  ;;  %v4871_v29 = vld [vmem:[%s5750_s10 + $0xc8] sm:$0xff] }
 0x3ab   : > { %v2298_v48 = vpack.c.b16 %v2297_v46, %v2297_v46  ;;  %3040 = vmatpush.bf16.msrb.mxu1 %v4888_v27  ;;  %v4874_v27 = vld [vmem:[%s5750_s10 + $0xe0] sm:$0xff] }
 0x3ac   : > { %2126 = vmatpush.bf16.msrb.mxu2 %v4817_v30  ;;  %v4887_v30 = vld [vmem:[%s5750_s10 + $0x148] sm:$0xff] }
 0x3ad   : > { %v2299_v50 = vrot.slane %v2298_v48, 2 }
 0x3ae   : > { %2332 = vmatpush.bf16.msrb.mxu3 %v4835_v31  ;;  %v1605_v35 = vpop.f32.mrf.mxu0  ;;  %v4848_v31 = vld [vmem:[%s5750_s10 + $0x10] sm:$0xff] }
 0x3af   : > { %4058 = vmatmul.msk.bf16.vlgmr.msra.gmra.mxu2 %vm542_vm0, %v1611_v11  ;;  %v1615_v39 = vpack.c.bf16 %v1605_v35, %v1605_v35  ;;  %3041 = vmatpush.bf16.msrb.mxu1 %v4887_v30  ;;  %v4879_v30 = vld [vmem:[%s5750_s10 + $0x108] sm:$0xff] }
 0x3b0   : > { %2277 = vmatpush.bf16.msra.mxu2 %v4832_v32 }
 0x3b1   : > { %v2401_v25 = vunpack.c.l.b16 %v1615_v39 }
 0x3b2   : > { %2333 = vmatpush.bf16.msrb.mxu3 %v4834_v33  ;;  %v4852_v33 = vld [vmem:[%s5750_s10 + $0x30] sm:$0xff] }
 0x3b3   : > { %v2402_v52 = vpack.c.b16 %v2401_v25, %v2401_v25  ;;  %2538 = vmatpush.bf16.msra.mxu0 %v4852_v33  ;;  %v4845_v25 = vld [vmem:[%s5749_s9] sm:$0xff] }
 0x3b4   : > { %2278 = vmatpush.bf16.msra.mxu2 %v4831_v34 }
 0x3b5   : > { %v2403_v53 = vrot.slane %v2402_v52, 2  ;;  %v4856_v52 = vld [vmem:[%s5750_s10 + $0x50] sm:$0xff] }
 0x3b6   : > { %2334 = vmatpush.bf16.msrb.mxu3 %v4833_v36  ;;  %v4847_v36 = vld [vmem:[%s5750_s10 + $0x8] sm:$0xff] }
 0x3b8   : > { %2279 = vmatpush.bf16.msra.mxu2 %v4830_v38 }
 0x3b9   : > { %4158 = vmatmul.msk.bf16.vlgmr.msra.gmra.mxu3 %vm542_vm0, %v1613_v17  ;;  %4258 = vmatmul.msk.bf16.vlgmr.msrb.gmra.mxu0 %vm542_vm0, %v1615_v39 }
 0x3bc   : > { %2280 = vmatpush.bf16.msra.mxu2 %v4829_v41 }
 0x3bf   : > { %4133 = vmatmul.msk.bf16.vlgmr.msrb.gmra.mxu2 %vm542_vm0, %v2091_v43 }
 0x3c0   : > { %2435 = vmatpush.bf16.msrb.mxu2 %v4844_v44 }
 0x3c4   : > { %2436 = vmatpush.bf16.msrb.mxu2 %v4843_v47 }
 0x3c8   : > { %2437 = vmatpush.bf16.msrb.mxu2 %v4842_v49  ;;  %v4857_v49 = vld [vmem:[%s5750_s10 + $0x58] sm:$0xff] }
 0x3c9   : > { %4233 = vmatmul.msk.bf16.vlgmr.msrb.gmra.mxu3 %vm542_vm0, %v2299_v50 }
 0x3cc   : > { %2438 = vmatpush.bf16.msrb.mxu2 %v4841_v51 }
 0x3cf   : > { %4208 = vmatmul.msk.bf16.vlgmr.msra.gmra.mxu2 %vm542_vm0, %v1614_v42  ;;  %v4941_v42 = vld [vmem:[%s5748_s8] ss:$0 sm:$0xff] }
 0x3d0   : > { %2577 = vmatpush.bf16.msra.mxu2 %v4849_v28 }
 0x3d4   : > { %2578 = vmatpush.bf16.msra.mxu2 %v4848_v31 }
 0x3d8   : > { %2579 = vmatpush.bf16.msra.mxu2 %v4847_v36  ;;  %v4892_v36 = vld [vmem:[%s5750_s10 + $0x170] sm:$0xff] }
 0x3df   : > { %4283 = vmatmul.msk.bf16.vlgmr.msrb.gmra.mxu2 %vm542_vm0, %v2403_v53  ;;  %v4846_v53 = vld [vmem:[%s5750_s10] sm:$0xff] }
 0x3e0   : > { %2580 = vmatpush.bf16.msra.mxu2 %v4846_v53  ;;  %v4901_v53 = vld [vmem:[%s5750_s10 + $0x1b8] sm:$0xff] }
 0x3fc   : > { %v1713_v45 = vpop.f32.mrf.mxu3 }
 0x402   : > { %v1673_v54 = vpop.f32.mrf.mxu2 }
 0x403   : > { %v1714_v55 = vadd.f32 %v1713_v45, %v1673_v54  ;;  %v4851_v45 = vld [vmem:[%s5750_s10 + $0x28] sm:$0xff] }
 0x404   : > { %v1715_v56 = vpop.f32.mrf.mxu3  ;;  %v4855_v54 = vld [vmem:[%s5750_s10 + $0x48] sm:$0xff]  ;;  %2539 = vmatpush.bf16.msra.mxu0 %v4851_v45 }
 0x405   : > { %v4850_v56 = vld [vmem:[%s5750_s10 + $0x20] sm:$0xff] }
 0x408   : > { %2540 = vmatpush.bf16.msra.mxu0 %v4850_v56  ;;  %v4906_v56 = vld [vmem:[%s5750_s10 + $0x1e0] sm:$0xff] }
 0x40a   : > { %v1675_v57 = vpop.f32.mrf.mxu2 }
 0x40b   : > { %v4854_v57 = vld [vmem:[%s5750_s10 + $0x40] sm:$0xff] }
 0x40c   : > { %v1816_v58 = vpop.f32.mrf.mxu3 }
 0x412   : > { %v1762_v59 = vpop.f32.mrf.mxu2 }
 0x413   : > { %v1766_v11 = vadd.f32 %v1762_v59, %v1714_v55  ;;  %v4865_v55 = vld [vmem:[%s5750_s10 + $0x98] sm:$0xff] }
 0x414   : > { %v1818_v60 = vpop.f32.mrf.mxu3  ;;  %2729 = vmatpush.bf16.msrb.mxu2 %v4865_v55  ;;  %v4861_v59 = vld [vmem:[%s5750_s10 + $0x78] sm:$0xff]  ;;  %v4900_v55 = vld [vmem:[%s5750_s10 + $0x1b0] sm:$0xff] }
 0x415   : > { %v1820_v14 = vadd.f32 %v1816_v58, %v1766_v11  ;;  %v4864_v58 = vld [vmem:[%s5750_s10 + $0x90] sm:$0xff]  ;;  %v4869_v60 = vld [vmem:[%s5750_s10 + $0xb8] sm:$0xff]  ;;  %2678 = vmatpush.bf16.msrb.mxu0 %v4861_v59 }
 0x416   : > { %v2074_v61 = vpop.f32.mrf.mxu0  ;;  %v4877_v11 = vld [vmem:[%s5750_s10 + $0xf8] sm:$0xff] }
 0x418   : > { %2730 = vmatpush.bf16.msrb.mxu2 %v4864_v58  ;;  %v4899_v58 = vld [vmem:[%s5750_s10 + $0x1a8] sm:$0xff] }
 0x419   : > { %2679 = vmatpush.bf16.msrb.mxu0 %v4860_v63 }
 0x41a   : > { %v1764_v62 = vpop.f32.mrf.mxu2 }
 0x41b   : > { %v4886_v62 = vld [vmem:[%s5750_s10 + $0x140] sm:$0xff] }
 0x41c   : > { %v1920_v0 = vpop.f32.mrf.mxu3  ;;  %3042 = vmatpush.bf16.msrb.mxu1 %v4886_v62 }
 0x41e   : > { %v2076_v1 = vpop.f32.mrf.mxu0 }
 0x41f   : > { %v4862_v1 = vld [vmem:[%s5750_s10 + $0x80] sm:$0xff] }
 0x422   : > { %v1866_v2 = vpop.f32.mrf.mxu2 }
 0x423   : > { %v1870_v16 = vadd.f32 %v1866_v2, %v1820_v14  ;;  %v4859_v2 = vld [vmem:[%s5750_s10 + $0x68] sm:$0xff]  ;;  %v4876_v14 = vld [vmem:[%s5750_s10 + $0xf0] sm:$0xff] }
 0x424   : > { %v1922_v3 = vpop.f32.mrf.mxu3  ;;  %2680 = vmatpush.bf16.msrb.mxu0 %v4859_v2 }
 0x425   : > { %v1924_v18 = vadd.f32 %v1920_v0, %v1870_v16  ;;  %v4868_v0 = vld [vmem:[%s5750_s10 + $0xb0] sm:$0xff]  ;;  %v4867_v3 = vld [vmem:[%s5750_s10 + $0xa8] sm:$0xff]  ;;  %v4873_v16 = vld [vmem:[%s5750_s10 + $0xd8] sm:$0xff] }
 0x426   : > { %v2232_v4 = vpop.f32.mrf.mxu0 }
 0x42a   : > { %v1868_v5 = vpop.f32.mrf.mxu2 }
 0x42b   : > { %v4858_v5 = vld [vmem:[%s5750_s10 + $0x60] sm:$0xff] }
 0x42c   : > { %v2024_v6 = vpop.f32.mrf.mxu3  ;;  %2681 = vmatpush.bf16.msrb.mxu0 %v4858_v5 }
 0x42e   : > { %v2234_v7 = vpop.f32.mrf.mxu0 }
 0x42f   : > { %v4904_v7 = vld [vmem:[%s5750_s10 + $0x1d0] sm:$0xff] }
 0x432   : > { %v1970_v8 = vpop.f32.mrf.mxu2 }
 0x433   : > { %v1974_v20 = vadd.f32 %v1970_v8, %v1924_v18  ;;  %v4903_v8 = vld [vmem:[%s5750_s10 + $0x1c8] sm:$0xff] }
 0x434   : > { %v2026_v9 = vpop.f32.mrf.mxu3 }
 0x435   : > { %v2028_v21 = vadd.f32 %v2024_v6, %v1974_v20  ;;  %v4866_v6 = vld [vmem:[%s5750_s10 + $0xa0] sm:$0xff] }
 0x436   : > { %v2386_v10 = vpop.f32.mrf.mxu0  ;;  %v4902_v9 = vld [vmem:[%s5750_s10 + $0x1c0] sm:$0xff] }
 0x437   : > { %v2078_v24 = vadd.f32 %v2074_v61, %v2028_v21  ;;  %v4863_v61 = vld [vmem:[%s5750_s10 + $0x88] sm:$0xff] }
 0x438   : > { %2731 = vmatpush.bf16.msrb.mxu2 %v4863_v61  ;;  %v4875_v21 = vld [vmem:[%s5750_s10 + $0xe8] sm:$0xff] }
 0x43a   : > { %v1972_v12 = vpop.f32.mrf.mxu2 }
 0x43c   : > { %v2178_v13 = vpop.f32.mrf.mxu3  ;;  %2732 = vmatpush.bf16.msrb.mxu2 %v4862_v1 }
 0x43e   : > { %v2388_v15 = vpop.f32.mrf.mxu0 }
 0x442   : > { %v2128_v17 = vpop.f32.mrf.mxu2 }
 0x443   : > { %v2132_v26 = vadd.f32 %v2128_v17, %v2078_v24  ;;  %v4881_v17 = vld [vmem:[%s5750_s10 + $0x118] sm:$0xff]  ;;  %v4880_v24 = vld [vmem:[%s5750_s10 + $0x110] sm:$0xff] }
 0x444   : > { %v2180_v19 = vpop.f32.mrf.mxu3 }
 0x445   : > { %v2182_v34 = vadd.f32 %v2178_v13, %v2132_v26 }
 0x447   : > { %v2236_v37 = vadd.f32 %v2232_v4, %v2182_v34  ;;  %v4905_v4 = vld [vmem:[%s5750_s10 + $0x1d8] sm:$0xff]  ;;  %v4870_v34 = vld [vmem:[%s5750_s10 + $0xc0] sm:$0xff] }
 0x448   : > { %3243 = vmatpush.bf16.msra.mxu1 %v4905_v4 }
 0x44a   : > { %v2130_v22 = vpop.f32.mrf.mxu2 }
 0x44c   : > { %v2336_v23 = vpop.f32.mrf.mxu3  ;;  %3244 = vmatpush.bf16.msra.mxu1 %v4904_v7 }
 0x450   : > { %3245 = vmatpush.bf16.msra.mxu1 %v4903_v8 }
 0x452   : > { %v2282_v32 = vpop.f32.mrf.mxu2 }
 0x453   : > { %v2286_v38 = vadd.f32 %v2282_v32, %v2236_v37  ;;  %v4893_v32 = vld [vmem:[%s5750_s10 + $0x178] sm:$0xff] }
 0x454   : > { %v2338_v35 = vpop.f32.mrf.mxu3  ;;  %3246 = vmatpush.bf16.msra.mxu1 %v4902_v9  ;;  %v4885_v37 = vld [vmem:[%s5750_s10 + $0x138] sm:$0xff] }
 0x455   : > { %v2340_v40 = vadd.f32 %v2336_v23, %v2286_v38  ;;  %v4872_v23 = vld [vmem:[%s5750_s10 + $0xd0] sm:$0xff]  ;;  %v4878_v35 = vld [vmem:[%s5750_s10 + $0x100] sm:$0xff]  ;;  %v4897_v38 = vld [vmem:[%s5750_s10 + $0x198] sm:$0xff] }
 0x457   : > { %v2390_v41 = vadd.f32 %v2386_v10, %v2340_v40 }
 0x45a   : > { %v2284_v39 = vpop.f32.mrf.mxu2 }
 0x462   : > { %v2440_v43 = vpop.f32.mrf.mxu2 }
 0x463   : > { %v2444_v44 = vadd.f32 %v2440_v43, %v2390_v41  ;;  %v4891_v41 = vld [vmem:[%s5750_s10 + $0x168] sm:$0xff]  ;;  %v4896_v43 = vld [vmem:[%s5750_s10 + $0x190] sm:$0xff] }
 0x465   : > { %v2449_v46 = vadd.f32 %v4941_v42, %v2444_v44  ;;  %v4884_v42 = vld [vmem:[%s5750_s10 + $0x130] sm:$0xff]  ;;  %v4890_v44 = vld [vmem:[%s5750_s10 + $0x160] sm:$0xff] }
 0x467   : > { %v2450_v47 = vmax.f32 %v2449_v46, 0.0  ;;  %v4883_v46 = vld [vmem:[%s5750_s10 + $0x128] sm:$0xff] }
 0x469   : > { %v2453_v48 = vpack.c.bf16 %v2450_v47, %v2450_v47  ;;  %v4895_v47 = vld [vmem:[%s5750_s10 + $0x188] sm:$0xff] }
 0x46a   : > { %v2442_v50 = vpop.f32.mrf.mxu2 }
 0x46b   : > { %v2465_v51 = vsel %vm2463_vm3, %v2453_v48, 0 }
 0x46c   : > { %2474 = vmatpush.bf16.msra.mxu3 %v2465_v51  ;;  %v4882_v51 = vld [vmem:[%s5750_s10 + $0x120] sm:$0xff] }
 0x46f   : > { %4288 = vmatmul.msk.bf16.vlgmr.msra.gmra.mxu3 %vm2459_vm4, %v4845_v25  ;;  %v4894_v25 = vld [vmem:[%s5750_s10 + $0x180] sm:$0xff] }
 0x470   : > { %2627 = vmatpush.bf16.msrb.mxu3 %v4857_v49  ;;  %v4909_v49 = vld [vmem:[%s5750_s10 + $0x1f8] sm:$0xff] }
 0x474   : > { %2628 = vmatpush.bf16.msrb.mxu3 %v4856_v52  ;;  %v4908_v52 = vld [vmem:[%s5750_s10 + $0x1f0] sm:$0xff] }
 0x478   : > { %2629 = vmatpush.bf16.msrb.mxu3 %v4855_v54  ;;  %v4907_v54 = vld [vmem:[%s5750_s10 + $0x1e8] sm:$0xff] }
 0x47c   : > { %2630 = vmatpush.bf16.msrb.mxu3 %v4854_v57 }
 0x480   : > { %2780 = vmatpush.bf16.msra.mxu3 %v4869_v60  ;;  %v4898_v60 = vld [vmem:[%s5750_s10 + $0x1a0] sm:$0xff] }
 0x484   : > { %2781 = vmatpush.bf16.msra.mxu3 %v4868_v0 }
 0x488   : > { %2782 = vmatpush.bf16.msra.mxu3 %v4867_v3 }
 0x48c   : > { %2783 = vmatpush.bf16.msra.mxu3 %v4866_v6  ;;  %v4917_v6 = vld [vmem:[%s5752_s12 + $0x38] sm:$0xff] }
 0x4f2   : > { %v2476_v10 = vpop.f32.mrf.mxu3 }
 0x4f3   : > { %v2481_v12 = vpack.c.bf16 %v2476_v10, %v2476_v10 }
 0x4f5   : > { %v2501_v13 = vunpack.c.l.b16 %v2481_v12  ;;  %4330 = vmatmul.msk.bf16.vlgmr.msra.gmra.mxu2 %vm542_vm0, %v2481_v12  ;;  %v4915_v12 = vld [vmem:[%s5752_s12 + $0x28] sm:$0xff] }
 0x4f6   : > { %2882 = vmatpush.bf16.msra.mxu2 %v4877_v11  ;;  %v4916_v11 = vld [vmem:[%s5752_s12 + $0x30] sm:$0xff] }
 0x4f7   : > { %v5580_v15 = vpack.c.b16 %v2501_v13, %v2501_v13 }
 0x4f9   : > { %v2504_v18 = vshrl.u32 %v5580_v15, 16  ;;  %v2595_v19 = vrot.slane %v5580_v15, 1  ;;  %v2697_v33 = vrot.slane %v5580_v15, 2  ;;  %v2799_v45 = vrot.slane %v5580_v15, 3 }
 0x4fa   : > { %v2478_v20 = vpop.f32.mrf.mxu3  ;;  %2883 = vmatpush.bf16.msra.mxu2 %v4876_v14 }
 0x4fb   : > { %v5593_v22 = vpack.c.bf16 %v2478_v20, %v2478_v20  ;;  %4313 = vmatmul.msk.bf16.vlgmr.msra.gmra.mxu0 %vm542_vm0, %v2504_v18  ;;  %4355 = vmatmul.msk.bf16.vlgmr.msrb.gmra.mxu3 %vm542_vm0, %v2595_v19  ;;  %v2646_v39 = vrot.slane %v2504_v18, 1  ;;  %v2748_v40 = vrot.slane %v2504_v18, 2  ;;  %v2850_v50 = vrot.slane %v2504_v18, 3  ;;  %v4913_v18 = vld [vmem:[%s5752_s12 + $0x18] sm:$0xff] }
 0x4fc   : > { %2831 = vmatpush.bf16.msra.mxu0 %v4873_v16  ;;  %2932 = vmatpush.bf16.msrb.mxu3 %v4881_v17  ;;  %v4914_v16 = vld [vmem:[%s5752_s12 + $0x20] sm:$0xff] }
 0x4fd   : > { %v2952_v26 = vunpack.c.l.b16 %v5593_v22 }
 0x4fe   : > { %2884 = vmatpush.bf16.msra.mxu2 %v4875_v21 }
 0x4ff   : > { %v5607_v28 = vpack.c.b16 %v2952_v26, %v2952_v26  ;;  %v4912_v26 = vld [vmem:[%s5752_s12 + $0x10] sm:$0xff] }
 0x500   : > { %2832 = vmatpush.bf16.msra.mxu0 %v4872_v23  ;;  %2933 = vmatpush.bf16.msrb.mxu3 %v4880_v24 }
 0x501   : > { %v3007_v31 = vrot.slane %v5607_v28, 1  ;;  %v3211_v48 = vrot.slane %v5607_v28, 3  ;;  %v2955_v57 = vshrl.u32 %v5607_v28, 16  ;;  %v3109_v61 = vrot.slane %v5607_v28, 2  ;;  %v4911_v28 = vld [vmem:[%s5752_s12 + $0x8] sm:$0xff] }
 0x502   : > { %2885 = vmatpush.bf16.msra.mxu2 %v4874_v27 }
 0x503   : > { %4555 = vmatmul.msk.bf16.vlgmr.msrb.gmra.mxu1 %vm542_vm0, %v3007_v31  ;;  %v3058_v59 = vrot.slane %v2955_v57, 1  ;;  %v3262_v62 = vrot.slane %v2955_v57, 3  ;;  %v3160_v63 = vrot.slane %v2955_v57, 2 }
 0x504   : > { %2833 = vmatpush.bf16.msra.mxu0 %v4871_v29  ;;  %2934 = vmatpush.bf16.msrb.mxu3 %v4879_v30 }
 0x505   : > { %4405 = vmatmul.msk.bf16.vlgmr.msrb.gmra.mxu2 %vm542_vm0, %v2697_v33 }
 0x506   : > { %3090 = vmatpush.bf16.msrb.mxu2 %v4893_v32 }
 0x508   : > { %2834 = vmatpush.bf16.msra.mxu0 %v4870_v34  ;;  %2935 = vmatpush.bf16.msrb.mxu3 %v4878_v35  ;;  %v4910_v34 = vld [vmem:[%s5752_s12] sm:$0xff] }
 0x50a   : > { %3091 = vmatpush.bf16.msrb.mxu2 %v4892_v36 }
 0x50b   : > { %4380 = vmatmul.msk.bf16.vlgmr.msrb.gmra.mxu0 %vm542_vm0, %v2646_v39  ;;  %4430 = vmatmul.msk.bf16.vlgmr.msra.gmra.mxu3 %vm542_vm0, %v2748_v40  ;;  %v4952_v40 = vmov 0  }
 0x50c   : > { %2988 = vmatpush.bf16.msrb.mxu0 %v4885_v37  ;;  %3141 = vmatpush.bf16.msra.mxu3 %v4897_v38  ;;  %v4950_v37 = vmov 5   ;;  %v4951_v38 = vmov 2  }
 0x50d   : > { %4936 = vset.pattern.permute.xlu2 %v4950_v37  ;;  %4932 = vset.pattern.permute.xlu0 %v4951_v38 }
 0x50e   : > { %3092 = vmatpush.bf16.msrb.mxu2 %v4891_v41  ;;  %4934 = vset.pattern.permute.xlu1 %v4952_v40 }
 0x510   : > { %2989 = vmatpush.bf16.msrb.mxu0 %v4884_v42  ;;  %3142 = vmatpush.bf16.msra.mxu3 %v4896_v43 }
 0x512   : > { %3093 = vmatpush.bf16.msrb.mxu2 %v4890_v44 }
 0x513   : > { %4655 = vmatmul.msk.bf16.vlgmr.msra.gmra.mxu1 %vm542_vm0, %v3211_v48 }
 0x514   : > { %2990 = vmatpush.bf16.msrb.mxu0 %v4883_v46  ;;  %3143 = vmatpush.bf16.msra.mxu3 %v4895_v47 }
 0x515   : > { %4480 = vmatmul.msk.bf16.vlgmr.msra.gmra.mxu2 %vm542_vm0, %v2850_v50 }
 0x516   : > { %3294 = vmatpush.bf16.msra.mxu2 %v4909_v49 }
 0x518   : > { %2991 = vmatpush.bf16.msrb.mxu0 %v4882_v51  ;;  %3144 = vmatpush.bf16.msra.mxu3 %v4894_v25 }
 0x51a   : > { %3295 = vmatpush.bf16.msra.mxu2 %v4908_v52 }
 0x51b   : > { %4455 = vmatmul.msk.bf16.vlgmr.msra.gmra.mxu0 %vm542_vm0, %v2799_v45  ;;  %4505 = vmatmul.msk.bf16.vlgmr.msrb.gmra.mxu3 %vm542_vm0, %v5593_v22 }
 0x51c   : > { %3192 = vmatpush.bf16.msra.mxu0 %v4901_v53  ;;  %3373 = vmatpush.bf16.msrb.mxu3 %v4917_v6 }
 0x51e   : > { %3296 = vmatpush.bf16.msra.mxu2 %v4907_v54 }
 0x520   : > { %3193 = vmatpush.bf16.msra.mxu0 %v4900_v55  ;;  %3374 = vmatpush.bf16.msrb.mxu3 %v4916_v11  ;;  %v3304_v55 = vld [vmem:[%s5751_s11] sm:$0x1] }
 0x522   : > { %3297 = vmatpush.bf16.msra.mxu2 %v4906_v56 }
 0x524   : > { %3194 = vmatpush.bf16.msra.mxu0 %v4899_v58  ;;  %3375 = vmatpush.bf16.msrb.mxu3 %v4915_v12 }
 0x525   : > { %4580 = vmatmul.msk.bf16.vlgmr.msrb.gmra.mxu2 %vm542_vm0, %v3058_v59 }
 0x528   : > { %3195 = vmatpush.bf16.msra.mxu0 %v4898_v60  ;;  %3376 = vmatpush.bf16.msrb.mxu3 %v4914_v16 }
 0x52b   : > { %4530 = vmatmul.msk.bf16.vlgmr.msrb.gmra.mxu0 %vm542_vm0, %v2955_v57  ;;  %4605 = vmatmul.msk.bf16.vlgmr.msra.gmra.mxu3 %vm542_vm0, %v3109_v61 }
 0x52c   : > { %3377 = vmatpush.bf16.msrb.mxu3 %v4913_v18 }
 0x530   : > { %3378 = vmatpush.bf16.msrb.mxu3 %v4912_v26 }
 0x534   : > { %3379 = vmatpush.bf16.msrb.mxu3 %v4911_v28 }
 0x535   : > { %4680 = vmatmul.msk.bf16.vlgmr.msra.gmra.mxu2 %vm542_vm0, %v3262_v62 }
 0x538   : > { %3380 = vmatpush.bf16.msrb.mxu3 %v4910_v34 }
 0x53b   : > { %4630 = vmatmul.msk.bf16.vlgmr.msra.gmra.mxu0 %vm542_vm0, %v3160_v63 }
 0x578   : > { %v2542_v0 = vpop.f32.mrf.mxu0  ;;  %v2582_v1 = vpop.f32.mrf.mxu2 }
 0x579   : > { %v2583_v20 = vadd.f32 %v2582_v1, %v2542_v0  ;;  %v4953_v0 = vmov 4   ;;  %v4954_v1 = vmov 1  }
 0x57e   : > { %v2632_v2 = vpop.f32.mrf.mxu3 }
 0x57f   : > { %v2636_v23 = vadd.f32 %v2632_v2, %v2583_v20  ;;  %v4955_v2 = vmov 3  }
 0x580   : > { %v2544_v3 = vpop.f32.mrf.mxu0  ;;  %v2584_v4 = vpop.f32.mrf.mxu2 }
 0x581   : > { %v3044_v5 = vpop.f32.mrf.mxu1  ;;  %v3388_v3 = vlaneseq }
 0x583   : > { %v3389_v4 = vand.u32 127, %v3388_v3 }
 0x585   : > { %v3391_v6 = vcvt.s32.f32 %v3389_v4 }
 0x586   : > { %v2634_v7 = vpop.f32.mrf.mxu3 }
 0x588   : > { %v2683_v8 = vpop.f32.mrf.mxu0  ;;  %v2734_v9 = vpop.f32.mrf.mxu2 }
 0x589   : > { %v3046_v10 = vpop.f32.mrf.mxu1  ;;  %v2687_v27 = vadd.f32 %v2683_v8, %v2636_v23  ;;  %v3393_v8 = vadd.f32 0.5, %v3391_v6 }
 0x58b   : > { %v2738_v30 = vadd.f32 %v2734_v9, %v2687_v27  ;;  %v3395_v10 = vmul.f32 0.0625, %v3393_v8 }
 0x58d   : > { %v3397_v12 = vfloor.f32 %v3395_v10 }
 0x58e   : > { %v2785_v13 = vpop.f32.mrf.mxu3 }
 0x58f   : > { %v2789_v33 = vadd.f32 %v2785_v13, %v2738_v30 }
 0x590   : > { %v2685_v14 = vpop.f32.mrf.mxu0  ;;  %v2736_v15 = vpop.f32.mrf.mxu2 }
 0x591   : > { %v3248_v17 = vpop.f32.mrf.mxu1  ;;  %v3399_v14 = vmul.f32 16.0, %v3397_v12 }
 0x593   : > { %v3401_v18 = vsub.f32 %v3391_v6, %v3399_v14 }
 0x595   : > { %v4715_v23 = vadd.f32 -7.5, %v3401_v18 }
 0x596   : > { %v2787_v19 = vpop.f32.mrf.mxu3 }
 0x598   : > { %v2836_v21 = vpop.f32.mrf.mxu0  ;;  %v2887_v22 = vpop.f32.mrf.mxu2 }
 0x599   : > { %v3250_v24 = vpop.f32.mrf.mxu1  ;;  %v2840_v35 = vadd.f32 %v2836_v21, %v2789_v33  ;;  %v4713_v21 = vadd.f32 -7.5, %v3397_v12 }
 0x59b   : > { %v2891_v39 = vadd.f32 %v2887_v22, %v2840_v35 }
 0x59e   : > { %v2937_v29 = vpop.f32.mrf.mxu3 }
 0x59f   : > { %v2941_v43 = vadd.f32 %v2937_v29, %v2891_v39 }
 0x5a0   : > { %v2838_v31 = vpop.f32.mrf.mxu0  ;;  %v2889_v32 = vpop.f32.mrf.mxu2 }
 0x5a6   : > { %v2939_v36 = vpop.f32.mrf.mxu3 }
 0x5a8   : > { %v2993_v41 = vpop.f32.mrf.mxu0  ;;  %v3095_v42 = vpop.f32.mrf.mxu2 }
 0x5a9   : > { %v2997_v44 = vadd.f32 %v2993_v41, %v2941_v43 }
 0x5ab   : > { %v3048_v47 = vadd.f32 %v3044_v5, %v2997_v44  ;;  %v3390_v5 = vadd.s32 128, %v3389_v4 }
 0x5ad   : > { %v3099_v50 = vadd.f32 %v3095_v42, %v3048_v47  ;;  %v3392_v7 = vcvt.s32.f32 %v3390_v5 }
 0x5ae   : > { %v3146_v46 = vpop.f32.mrf.mxu3 }
 0x5af   : > { %v3150_v25 = vadd.f32 %v3146_v46, %v3099_v50  ;;  %v3394_v9 = vadd.f32 0.5, %v3392_v7 }
 0x5b0   : > { %v2995_v48 = vpop.f32.mrf.mxu0  ;;  %v3097_v49 = vpop.f32.mrf.mxu2 }
 0x5b1   : > { %v3396_v11 = vmul.f32 0.0625, %v3394_v9 }
 0x5b3   : > { %v3398_v13 = vfloor.f32 %v3396_v11 }
 0x5b5   : > { %v3400_v15 = vmul.f32 16.0, %v3398_v13  ;;  %v4714_v22 = vadd.f32 -7.5, %v3398_v13 }
 0x5b6   : > { %v3148_v51 = vpop.f32.mrf.mxu3 }
 0x5b7   : > { %v3402_v19 = vsub.f32 %v3392_v7, %v3400_v15 }
 0x5b8   : > { %v3197_v52 = vpop.f32.mrf.mxu0  ;;  %v3299_v53 = vpop.f32.mrf.mxu2 }
 0x5b9   : > { %v3201_v45 = vadd.f32 %v3197_v52, %v3150_v25  ;;  %v4716_v24 = vadd.f32 -7.5, %v3402_v19 }
 0x5bb   : > { %v3252_v54 = vadd.f32 %v3248_v17, %v3201_v45 }
 0x5bd   : > { %v3303_v56 = vadd.f32 %v3299_v53, %v3252_v54 }
 0x5bf   : > { %v3305_v57 = vadd.f32 %v3304_v55, %v3303_v56 }
 0x5c0   : > { %v3199_v58 = vpop.f32.mrf.mxu0  ;;  %v3301_v59 = vpop.f32.mrf.mxu2 }
 0x5c1   : > { %v3306_v60 = vmax.f32 %v3305_v57, 0.0 }
 0x5c3   : > { %v3308_v61 = vpack.c.bf16 %v3306_v60, %v3306_v60 }
 0x5c5   : > { %3381 = vmatmul.bf16.vlgmr.msrb.gmra.mxu3 %v3308_v61 }
 0x648   : > { %v3382_v62 = vpop.f32.mrf.mxu3 }
 0x649   : > { %3387 = vst.msk [vmem:[%s471_s23] sm:$0x1] %vm3386_vm5, %v3382_v62  ;;  %3443 = vperm.xlu2 %4936, %v3382_v62   ;;  %3409 = vperm.xlu1 %4934, %v3382_v62  }
 0x64a   : > { %3429 = vperm.xlu0 %4932, %v3382_v62  }
 0x650   : > { %v3384_v63 = vpop.f32.mrf.mxu3 }
 0x651   : > { %4937 = vset.pattern.permute.xlu2 %v4953_v0  ;;  %4935 = vset.pattern.permute.xlu1 %v4954_v1 }
 0x652   : > { %4933 = vset.pattern.permute.xlu0 %v4955_v2  ;;  %3423 = vperm.xlu2 %4937, %v3382_v62  }
 0x653   : > { %3415 = vperm.xlu1 %4935, %v3382_v62   ;;  %3435 = vperm.xlu0 %4933, %v3382_v62  }
 0x65b   : > { %4938 = vset.pattern.permute.xlu0 %v4950_v37 }
 0x6a3   : > { %v3444_v20 = vpop.permute.xlu2 %3443 }
 0x6ac   : > { %v3424_v42 = vpop.permute.xlu2 %3423 }
 0x6bb   : > { %v3410_v16 = vpop.permute.xlu1 %3409 }
 0x6bc   : > { %v3430_v17 = vpop.permute.xlu0 %3429  ;;  %v3413_v26 = vmul.f32 %v4714_v22, %v3410_v16  ;;  %v3412_v35 = vmul.f32 %v4713_v21, %v3410_v16 }
 0x6bd   : > { %v3432_v27 = vmul.f32 %v4713_v21, %v3430_v17  ;;  %v3433_v28 = vmul.f32 %v4714_v22, %v3430_v17 }
 0x6c5   : > { %v3416_v29 = vpop.permute.xlu1 %3415  ;;  %v3436_v30 = vpop.permute.xlu0 %3435 }
 0x6c6   : > { %v3418_v31 = vmul.f32 %v4715_v23, %v3416_v29  ;;  %v3419_v32 = vmul.f32 %v4716_v24, %v3416_v29  ;;  %v3438_v33 = vmul.f32 %v4715_v23, %v3436_v30  ;;  %v3439_v34 = vmul.f32 %v4716_v24, %v3436_v30 }
 0x6c8   : > { %v3421_v36 = vadd.f32 %v3419_v32, %v3413_v26  ;;  %v3440_v37 = vadd.f32 %v3438_v33, %v3432_v27  ;;  %v3441_v38 = vadd.f32 %v3439_v34, %v3433_v28  ;;  %v3420_v39 = vadd.f32 %v3418_v31, %v3412_v35 }
 0x6ca   : > { %v3446_v40 = vadd.f32 %v3444_v20, %v3440_v37  ;;  %v3447_v41 = vadd.f32 %v3444_v20, %v3441_v38  ;;  %v3427_v43 = vadd.f32 %v3424_v42, %v3421_v36  ;;  %v3426_v47 = vadd.f32 %v3424_v42, %v3420_v39 }
 0x6cc   : > { %v3450_v44 = vrot.slane %v3446_v40, 7  ;;  %v3451_v46 = vrot.slane %v3447_v41, 7 }
 0x6ce   : > { %v3456_v48 = vsel %vm3454_vm6, %v3427_v43, %v3451_v46  ;;  %v3455_v50 = vsel %vm3454_vm6, %v3426_v47, %v3450_v44 }
 0x6cf   : > { %v3459_v49 = vrot.slane %v3456_v48, 6 }
 0x6d1   : > { %v3460_v51 = vsel %vm2463_vm3, %v3455_v50, %v3459_v49 }
 0x6d2   : > { %3462 = vst [vmem:[%s476_s27] sm:$0xf] %v3460_v51 }
 0x6d3 PF: > { %s25_s29 = sadd.s32 1, %s4948_s29  }
 0x6d4   : > { %p22_p4 = scmp.ge.s32.totalorder %s25_s29, 4  }
 0x6d6   :  { %24 = sbr.rel (!%p22_p4) target bundleno = 1 (0x1), region = 159 }

</bundles_post_ra>
